<compile_context>
chip_gen: v7x
topology: tpu7x:2x2x1
jax: 0.10.0
libtpu: 0.0.40
codegen_flags: <defaults>
</compile_context>

<pallas_src>
import jax
import jax.numpy as jnp
from jax.experimental import pallas as pl
from jax.experimental.pallas import tpu as pltpu

STATE_SIZE = 24
ACTION_SIZE = 5
NUM_ATOMS = 51
V_MIN, V_MAX = -10.0, 10.0
HIDDEN = (256, 256, 128)
HEAD = ACTION_SIZE * NUM_ATOMS   # 255 (real head width)
HEAD_PAD = 256                   # lane-dense padded head width
APAD = 128                       # lane-dense padded action axis
WOFF = 64                        # lane offset of support-weighted sums in fused segment matmul
SUM_EPS = 1e-20                  # guards an action row whose exp() underflowed to 0


def _round_up(n, m):
    return ((n + m - 1) // m) * m


def _choose_tb(B):
    """Batch tile: prefer >= 2 grid blocks (dual-TC v7x), cap at 512, floor at 128."""
    for tb in (512, 256, 128):
        if B >= 2 * tb:
            return tb
    if B >= 128:
        return 128
    return _round_up(max(B, 1), 8)


def _dqn_kernel(x_ref, w1_ref, b1_ref, w2_ref, b2_ref, w3_ref, b3_ref,
                w4_ref, b4_ref, segcat_ref, segt_ref, padb_ref,
                qv_ref, qp_ref):
    """MLP (24->256->256->128->256pad) + per-action softmax + expected Q.

    Weights are bf16 (matmul operands only); all elementwise math stays f32
    (v5e has no bf16 VPU/EUP). The fused segment matmul produces per-action
    exp-sums in lanes 0..4 and support-weighted sums in lanes 64..68; an XLU
    roll aligns them so the q_values store is a single lane-dense (TB, 128)
    write. The padded-lane bias + max() guard keeps the approximate reciprocal
    finite everywhere, so no inf/NaN can leak through the broadcast matmul.
    """
    f32 = jnp.float32
    bf16 = jnp.bfloat16

    x = x_ref[...].astype(bf16)
    h1 = jnp.maximum(
        jnp.dot(x, w1_ref[...], preferred_element_type=f32) + b1_ref[...], 0.0)
    h2 = jnp.maximum(
        jnp.dot(h1.astype(bf16), w2_ref[...], preferred_element_type=f32) + b2_ref[...], 0.0)
    h3 = jnp.maximum(
        jnp.dot(h2.astype(bf16), w3_ref[...], preferred_element_type=f32) + b3_ref[...], 0.0)
    logits = jnp.dot(h3.astype(bf16), w4_ref[...], preferred_element_type=f32) + b4_ref[...]
    # logits: (TB, 256) f32; column 255 is the zero-padded dummy.

    # Per-action softmax over the 51 atoms. A single per-row max is a valid
    # shift for every action's softmax (the constant cancels exactly).
    m = jnp.max(logits, axis=-1, keepdims=True)                       # (TB, 1)
    e = jnp.exp(logits - m)                                           # (TB, 256)

    # One fused segment matmul: lanes 0..4 hold per-action sums, lanes 64..68
    # hold support-weighted sums; dummy head column contributes to neither.
    comb = jnp.dot(e, segcat_ref[...], preferred_element_type=f32)    # (TB, 128)
    # Guard: +1 on every non-sum lane, clamp real sums away from 0.
    guarded = jnp.maximum(comb + padb_ref[...], SUM_EPS)
    inv = pl.reciprocal(guarded, approx=True)                         # EUP, (TB, 128)

    # Align the support-weighted sums (lanes 64..68) with the inverses (0..4).
    wsum_aligned = pltpu.roll(comb, APAD - WOFF, 1)                   # XLU, free slot
    qv_ref[...] = wsum_aligned * inv                                  # lane-dense (TB, 128) store

    # Broadcast 1/sum back over the 256 head lanes (padded action rows of segt
    # are zero, dummy head column gets 0), then one lane-dense store.
    inv_b = jnp.dot(inv, segt_ref[...], preferred_element_type=f32)   # (TB, 256)
    qp_ref[...] = (e * inv_b).astype(qp_ref.dtype)


def distributional_dqn_forward(x, params, support, *, block_b=None,
                               probs_dtype=jnp.float32, core_parallel=False,
                               return_padded=False):
    """Returns (q_values (B, A), q_probs (B, A, N)) — same as the PyTorch forward.

    With return_padded=True, returns the raw padded slabs ((b_pad, 128),
    (b_pad, 256)) and lets the consumer slice lazily (avoids an extra HBM
    round-trip of the probability tensor).
    """
    B = x.shape[0]
    (w1, b1), (w2, b2), (w3, b3), (w4, b4) = params

    bf16 = jnp.bfloat16
    f32 = jnp.float32
    w1 = w1.astype(bf16)
    w2 = w2.astype(bf16)
    w3 = w3.astype(bf16)
    w4p = jnp.pad(w4, ((0, 0), (0, HEAD_PAD - HEAD))).astype(bf16)    # (128, 256)
    b1 = b1.astype(f32)
    b2 = b2.astype(f32)
    b3 = b3.astype(f32)
    b4p = jnp.pad(b4.astype(f32), ((0, 0), (0, HEAD_PAD - HEAD)))     # (1, 256)

    # Segment matrices for the per-action softmax over the padded head.
    col = jnp.arange(HEAD_PAD)
    act = jnp.where(col < HEAD, col // NUM_ATOMS, APAD)               # dummy column -> no action
    a_idx = jnp.arange(APAD)
    sup_col = jnp.where(col < HEAD, support[col % NUM_ATOMS], 0.0).astype(f32)
    seg_sum = (act[:, None] == a_idx[None, :]).astype(f32)                            # cols 0..4
    seg_wsum = (act[:, None] == (a_idx[None, :] - WOFF)).astype(f32) * sup_col[:, None]  # cols 64..68
    segcat = seg_sum + seg_wsum                                        # (256, 128) fused segment matrix
    segt = (a_idx[:, None] == act[None, :]).astype(f32)                # (128, 256) broadcast-back
    padb = (a_idx >= ACTION_SIZE).astype(f32)[None, :]                 # (1, 128) reciprocal guard

    # Batch tiling: weights/segment matrices use a constant index_map (DMA'd
    # once, stay VMEM-resident); x and the outputs are tiled along the batch.
    tb = block_b if block_b is not None else _choose_tb(B)
    b_pad = _round_up(B, tb)
    xp = x.astype(f32)
    if b_pad != B:
        xp = jnp.pad(xp, ((0, b_pad - B), (0, 0)))
    n_blocks = b_pad // tb

    batch_spec = lambda shape: pl.BlockSpec(shape, lambda i: (i, 0))
    const_spec = lambda shape: pl.BlockSpec(shape, lambda i: (0, 0))

    # pltpu.CORE_PARALLEL shards the batch axis across v7x's two TensorCores;
    # default PARALLEL is a safe no-op on single-TC chips (v5e/v6e).
    sem = pltpu.CORE_PARALLEL if core_parallel else pltpu.PARALLEL

    qv_pad, qp_pad = pl.pallas_call(
        _dqn_kernel,
        grid=(n_blocks,),
        in_specs=[
            batch_spec((tb, STATE_SIZE)),
            const_spec(w1.shape), const_spec(b1.shape),
            const_spec(w2.shape), const_spec(b2.shape),
            const_spec(w3.shape), const_spec(b3.shape),
            const_spec(w4p.shape), const_spec(b4p.shape),
            const_spec(segcat.shape), const_spec(segt.shape), const_spec(padb.shape),
        ],
        out_specs=[
            batch_spec((tb, APAD)),
            batch_spec((tb, HEAD_PAD)),
        ],
        out_shape=(
            jax.ShapeDtypeStruct((b_pad, APAD), jnp.float32),
            jax.ShapeDtypeStruct((b_pad, HEAD_PAD), probs_dtype),
        ),
        compiler_params=pltpu.CompilerParams(dimension_semantics=(sem,)),
    )(xp, w1, b1, w2, b2, w3, b3, w4p, b4p, segcat, segt, padb)

    if return_padded:
        return qv_pad, qp_pad
    q_values = qv_pad[:B, :ACTION_SIZE]
    q_probs = qp_pad[:B, :HEAD].reshape(B, ACTION_SIZE, NUM_ATOMS)
    return q_values, q_probs


def init_params(key):
    """Kaiming-uniform (relu) weights, zero biases — matches initialize_weights."""
    dims = (STATE_SIZE,) + HIDDEN + (ACTION_SIZE * NUM_ATOMS,)
    params = []
    for i in range(len(dims) - 1):
        key, sub = jax.random.split(key)
        fan_in, fan_out = dims[i], dims[i + 1]
        bound = float(jnp.sqrt(6.0 / fan_in))  # gain=sqrt(2), bound=sqrt(3)*gain/sqrt(fan_in)
        w = jax.random.uniform(sub, (fan_in, fan_out), jnp.float32, -bound, bound)
        b = jnp.zeros((1, fan_out), jnp.float32)
        params.append((w, b))
    return tuple(params)


def reference_forward(x, params, support):
    """Plain-JAX reference using the same bf16 matmul-operand quantization."""
    bf16 = jnp.bfloat16
    f32 = jnp.float32
    h = x.astype(f32)
    for (w, b) in params[:-1]:
        h = jnp.maximum(
            jnp.dot(h.astype(bf16), w.astype(bf16), preferred_element_type=f32) + b, 0.0)
    w4, b4 = params[-1]
    logits = jnp.dot(h.astype(bf16), w4.astype(bf16), preferred_element_type=f32) + b4
    logits = logits.reshape(-1, ACTION_SIZE, NUM_ATOMS)
    p = jax.nn.softmax(logits, axis=-1)
    qv = jnp.sum(p * support.reshape(1, 1, -1), axis=-1)
    return qv, p


if __name__ == "__main__":
    key = jax.random.PRNGKey(0)
    k_param, k_x = jax.random.split(key)

    params = init_params(k_param)
    support = jnp.linspace(V_MIN, V_MAX, NUM_ATOMS, dtype=jnp.float32)

    # Normalized BlackJack-style states in [0, 1]; batch of 256 → two 128-row tiles
    # (>= 2 grid blocks so a dual-TC chip can split the batch axis).
    B = 256
    x = jax.random.uniform(k_x, (B, STATE_SIZE), jnp.float32)

    fwd = jax.jit(distributional_dqn_forward)
    q_values, q_probs = fwd(x, params, support)
    jax.block_until_ready((q_values, q_probs))

    # Sanity check against a plain-JAX reference of the same forward pass.
    qv_ref, qp_ref = jax.jit(reference_forward)(x, params, support)
    jax.block_until_ready((qv_ref, qp_ref))

    assert q_values.shape == (B, ACTION_SIZE)
    assert q_probs.shape == (B, ACTION_SIZE, NUM_ATOMS)
    # Probabilities must be a valid per-action distribution.
    assert jnp.all(jnp.abs(jnp.sum(q_probs, axis=-1) - 1.0) < 5e-3)
    # Approx reciprocal + bf16 matmul operands → slightly looser tolerances.
    assert jnp.allclose(q_probs, qp_ref, atol=5e-3, rtol=5e-2)
    assert jnp.allclose(q_values, qv_ref, atol=5e-2, rtol=5e-2)

    print("KERNEL_OK")
</pallas_src>

<mosaic_0001>
module attributes {stable_mosaic.version = 11 : i64} {
  func.func @_dqn_kernel(%arg0: i32, %arg1: memref<128x24xf32, #tpu.memory_space<vmem>>, %arg2: memref<24x256xbf16, #tpu.memory_space<vmem>>, %arg3: memref<1x256xf32, #tpu.memory_space<vmem>>, %arg4: memref<256x256xbf16, #tpu.memory_space<vmem>>, %arg5: memref<1x256xf32, #tpu.memory_space<vmem>>, %arg6: memref<256x128xbf16, #tpu.memory_space<vmem>>, %arg7: memref<1x128xf32, #tpu.memory_space<vmem>>, %arg8: memref<128x256xbf16, #tpu.memory_space<vmem>>, %arg9: memref<1x256xf32, #tpu.memory_space<vmem>>, %arg10: memref<256x128xf32, #tpu.memory_space<vmem>>, %arg11: memref<128x256xf32, #tpu.memory_space<vmem>>, %arg12: memref<1x128xf32, #tpu.memory_space<vmem>>, %arg13: memref<128x128xf32, #tpu.memory_space<vmem>>, %arg14: memref<128x256xf32, #tpu.memory_space<vmem>>) attributes {dimension_semantics = [#tpu.dimension_semantics<parallel>], iteration_bounds = array<i64: 2>, scalar_prefetch = 0 : i64, scratch_operands = 0 : i64, tpu.core_type = #tpu.core_type<tc>, window_params = [{transform_indices = @transform_0, window_bounds = array<i64: 128, 24>}, {pipeline_mode = #tpu.pipeline_mode<synchronous>, transform_indices = @transform_1, window_bounds = array<i64: 24, 256>}, {pipeline_mode = #tpu.pipeline_mode<synchronous>, transform_indices = @transform_2, window_bounds = array<i64: 1, 256>}, {pipeline_mode = #tpu.pipeline_mode<synchronous>, transform_indices = @transform_3, window_bounds = array<i64: 256, 256>}, {pipeline_mode = #tpu.pipeline_mode<synchronous>, transform_indices = @transform_4, window_bounds = array<i64: 1, 256>}, {pipeline_mode = #tpu.pipeline_mode<synchronous>, transform_indices = @transform_5, window_bounds = array<i64: 256, 128>}, {pipeline_mode = #tpu.pipeline_mode<synchronous>, transform_indices = @transform_6, window_bounds = array<i64: 1, 128>}, {pipeline_mode = #tpu.pipeline_mode<synchronous>, transform_indices = @transform_7, window_bounds = array<i64: 128, 256>}, {pipeline_mode = #tpu.pipeline_mode<synchronous>, transform_indices = @transform_8, window_bounds = array<i64: 1, 256>}, {pipeline_mode = #tpu.pipeline_mode<synchronous>, transform_indices = @transform_9, window_bounds = array<i64: 256, 128>}, {pipeline_mode = #tpu.pipeline_mode<synchronous>, transform_indices = @transform_10, window_bounds = array<i64: 128, 256>}, {pipeline_mode = #tpu.pipeline_mode<synchronous>, transform_indices = @transform_11, window_bounds = array<i64: 1, 128>}, {transform_indices = @transform_12, window_bounds = array<i64: 128, 128>}, {transform_indices = @transform_13, window_bounds = array<i64: 128, 256>}]} {
    %c0 = arith.constant 0 : index
    %c0_0 = arith.constant 0 : index
    %0 = vector.load %arg1[%c0, %c0_0] : memref<128x24xf32, #tpu.memory_space<vmem>>, vector<128x24xf32>
    %1 = arith.truncf %0 : vector<128x24xf32> to vector<128x24xbf16>
    %c0_1 = arith.constant 0 : index
    %c0_2 = arith.constant 0 : index
    %2 = vector.load %arg2[%c0_1, %c0_2] : memref<24x256xbf16, #tpu.memory_space<vmem>>, vector<24x256xbf16>
    %cst = arith.constant dense<0.000000e+00> : vector<128x256xf32>
    %3 = tpu.matmul %1, %2, %cst {dimension_numbers = #tpu.dot_dimension_numbers<[1], [0], [0], [1], [0, 0, 1, 1], [], []>} : vector<128x24xbf16>, vector<24x256xbf16>, vector<128x256xf32> -> vector<128x256xf32>
    %c0_3 = arith.constant 0 : index
    %c0_4 = arith.constant 0 : index
    %4 = vector.load %arg3[%c0_3, %c0_4] : memref<1x256xf32, #tpu.memory_space<vmem>>, vector<1x256xf32>
    %5 = vector.broadcast %4 : vector<1x256xf32> to vector<128x256xf32>
    %6 = arith.addf %3, %5 : vector<128x256xf32>
    %cst_5 = arith.constant 0.000000e+00 : f32
    %7 = vector.broadcast %cst_5 : f32 to vector<128x256xf32>
    %8 = arith.maximumf %6, %7 : vector<128x256xf32>
    %9 = arith.truncf %8 : vector<128x256xf32> to vector<128x256xbf16>
    %c0_6 = arith.constant 0 : index
    %c0_7 = arith.constant 0 : index
    %10 = vector.load %arg4[%c0_6, %c0_7] : memref<256x256xbf16, #tpu.memory_space<vmem>>, vector<256x256xbf16>
    %cst_8 = arith.constant dense<0.000000e+00> : vector<128x256xf32>
    %11 = tpu.matmul %9, %10, %cst_8 {dimension_numbers = #tpu.dot_dimension_numbers<[1], [0], [0], [1], [0, 0, 1, 1], [], []>} : vector<128x256xbf16>, vector<256x256xbf16>, vector<128x256xf32> -> vector<128x256xf32>
    %c0_9 = arith.constant 0 : index
    %c0_10 = arith.constant 0 : index
    %12 = vector.load %arg5[%c0_9, %c0_10] : memref<1x256xf32, #tpu.memory_space<vmem>>, vector<1x256xf32>
    %13 = vector.broadcast %12 : vector<1x256xf32> to vector<128x256xf32>
    %14 = arith.addf %11, %13 : vector<128x256xf32>
    %cst_11 = arith.constant 0.000000e+00 : f32
    %15 = vector.broadcast %cst_11 : f32 to vector<128x256xf32>
    %16 = arith.maximumf %14, %15 : vector<128x256xf32>
    %17 = arith.truncf %16 : vector<128x256xf32> to vector<128x256xbf16>
    %c0_12 = arith.constant 0 : index
    %c0_13 = arith.constant 0 : index
    %18 = vector.load %arg6[%c0_12, %c0_13] : memref<256x128xbf16, #tpu.memory_space<vmem>>, vector<256x128xbf16>
    %cst_14 = arith.constant dense<0.000000e+00> : vector<128x128xf32>
    %19 = tpu.matmul %17, %18, %cst_14 {dimension_numbers = #tpu.dot_dimension_numbers<[1], [0], [0], [1], [0, 0, 1, 1], [], []>} : vector<128x256xbf16>, vector<256x128xbf16>, vector<128x128xf32> -> vector<128x128xf32>
    %c0_15 = arith.constant 0 : index
    %c0_16 = arith.constant 0 : index
    %20 = vector.load %arg7[%c0_15, %c0_16] : memref<1x128xf32, #tpu.memory_space<vmem>>, vector<1x128xf32>
    %21 = vector.broadcast %20 : vector<1x128xf32> to vector<128x128xf32>
    %22 = arith.addf %19, %21 : vector<128x128xf32>
    %cst_17 = arith.constant 0.000000e+00 : f32
    %23 = vector.broadcast %cst_17 : f32 to vector<128x128xf32>
    %24 = arith.maximumf %22, %23 : vector<128x128xf32>
    %25 = arith.truncf %24 : vector<128x128xf32> to vector<128x128xbf16>
    %c0_18 = arith.constant 0 : index
    %c0_19 = arith.constant 0 : index
    %26 = vector.load %arg8[%c0_18, %c0_19] : memref<128x256xbf16, #tpu.memory_space<vmem>>, vector<128x256xbf16>
    %cst_20 = arith.constant dense<0.000000e+00> : vector<128x256xf32>
    %27 = tpu.matmul %25, %26, %cst_20 {dimension_numbers = #tpu.dot_dimension_numbers<[1], [0], [0], [1], [0, 0, 1, 1], [], []>} : vector<128x128xbf16>, vector<128x256xbf16>, vector<128x256xf32> -> vector<128x256xf32>
    %c0_21 = arith.constant 0 : index
    %c0_22 = arith.constant 0 : index
    %28 = vector.load %arg9[%c0_21, %c0_22] : memref<1x256xf32, #tpu.memory_space<vmem>>, vector<1x256xf32>
    %29 = vector.broadcast %28 : vector<1x256xf32> to vector<128x256xf32>
    %30 = arith.addf %27, %29 : vector<128x256xf32>
    %cst_23 = arith.constant dense<0xFF800000> : vector<128xf32>
    %31 = vector.multi_reduction <maximumf>, %30, %cst_23 [1] : vector<128x256xf32> to vector<128xf32>
    %32 = vector.shape_cast %31 : vector<128xf32> to vector<128x1xf32>
    %33 = vector.broadcast %32 : vector<128x1xf32> to vector<128x256xf32>
    %34 = arith.subf %30, %33 : vector<128x256xf32>
    %35 = math.exp %34 : vector<128x256xf32>
    %c0_24 = arith.constant 0 : index
    %c0_25 = arith.constant 0 : index
    %36 = vector.load %arg10[%c0_24, %c0_25] : memref<256x128xf32, #tpu.memory_space<vmem>>, vector<256x128xf32>
    %cst_26 = arith.constant dense<0.000000e+00> : vector<128x128xf32>
    %37 = tpu.matmul %35, %36, %cst_26 {dimension_numbers = #tpu.dot_dimension_numbers<[1], [0], [0], [1], [0, 0, 1, 1], [], []>} : vector<128x256xf32>, vector<256x128xf32>, vector<128x128xf32> -> vector<128x128xf32>
    %c0_27 = arith.constant 0 : index
    %c0_28 = arith.constant 0 : index
    %38 = vector.load %arg12[%c0_27, %c0_28] : memref<1x128xf32, #tpu.memory_space<vmem>>, vector<1x128xf32>
    %39 = vector.broadcast %38 : vector<1x128xf32> to vector<128x128xf32>
    %40 = arith.addf %37, %39 : vector<128x128xf32>
    %cst_29 = arith.constant 9.99999968E-21 : f32
    %41 = vector.broadcast %cst_29 : f32 to vector<128x128xf32>
    %42 = arith.maximumf %40, %41 : vector<128x128xf32>
    %43 = tpu.reciprocal %42 {approx = true} : vector<128x128xf32> -> vector<128x128xf32>
    %c64_i32 = arith.constant 64 : i32
    %44 = tpu.dynamic_rotate %37 by %c64_i32 dim 1 : vector<128x128xf32>, i32 -> vector<128x128xf32>
    %45 = arith.mulf %44, %43 : vector<128x128xf32>
    %c0_30 = arith.constant 0 : index
    %c0_31 = arith.constant 0 : index
    %46 = vector.load %arg13[%c0_30, %c0_31] : memref<128x128xf32, #tpu.memory_space<vmem>>, vector<128x128xf32>
    tpu.vector_store %arg13[%c0_30, %c0_31], %45 {strides = array<i32>} : memref<128x128xf32, #tpu.memory_space<vmem>>, vector<128x128xf32>,
    %c0_32 = arith.constant 0 : index
    %c0_33 = arith.constant 0 : index
    %47 = vector.load %arg11[%c0_32, %c0_33] : memref<128x256xf32, #tpu.memory_space<vmem>>, vector<128x256xf32>
    %cst_34 = arith.constant dense<0.000000e+00> : vector<128x256xf32>
    %48 = tpu.matmul %43, %47, %cst_34 {dimension_numbers = #tpu.dot_dimension_numbers<[1], [0], [0], [1], [0, 0, 1, 1], [], []>} : vector<128x128xf32>, vector<128x256xf32>, vector<128x256xf32> -> vector<128x256xf32>
    %49 = arith.mulf %35, %48 : vector<128x256xf32>
    %c0_35 = arith.constant 0 : index
    %c0_36 = arith.constant 0 : index
    %50 = vector.load %arg14[%c0_35, %c0_36] : memref<128x256xf32, #tpu.memory_space<vmem>>, vector<128x256xf32>
    tpu.vector_store %arg14[%c0_35, %c0_36], %49 {strides = array<i32>} : memref<128x256xf32, #tpu.memory_space<vmem>>, vector<128x256xf32>,
    return
  }
  func.func @transform_0(%arg0: i32) -> (i32, i32) {
    %c0_i32 = arith.constant 0 : i32
    %c0_i32_0 = arith.constant 0 : i32
    return %arg0, %c0_i32 : i32, i32
  }
  func.func @transform_1(%arg0: i32) -> (i32, i32) {
    %c0_i32 = arith.constant 0 : i32
    %c0_i32_0 = arith.constant 0 : i32
    %c0_i32_1 = arith.constant 0 : i32
    return %c0_i32, %c0_i32_0 : i32, i32
  }
  func.func @transform_2(%arg0: i32) -> (i32, i32) {
    %c0_i32 = arith.constant 0 : i32
    %c0_i32_0 = arith.constant 0 : i32
    %c0_i32_1 = arith.constant 0 : i32
    return %c0_i32, %c0_i32_0 : i32, i32
  }
  func.func @transform_3(%arg0: i32) -> (i32, i32) {
    %c0_i32 = arith.constant 0 : i32
    %c0_i32_0 = arith.constant 0 : i32
    %c0_i32_1 = arith.constant 0 : i32
    return %c0_i32, %c0_i32_0 : i32, i32
  }
  func.func @transform_4(%arg0: i32) -> (i32, i32) {
    %c0_i32 = arith.constant 0 : i32
    %c0_i32_0 = arith.constant 0 : i32
    %c0_i32_1 = arith.constant 0 : i32
    return %c0_i32, %c0_i32_0 : i32, i32
  }
  func.func @transform_5(%arg0: i32) -> (i32, i32) {
    %c0_i32 = arith.constant 0 : i32
    %c0_i32_0 = arith.constant 0 : i32
    %c0_i32_1 = arith.constant 0 : i32
    return %c0_i32, %c0_i32_0 : i32, i32
  }
  func.func @transform_6(%arg0: i32) -> (i32, i32) {
    %c0_i32 = arith.constant 0 : i32
    %c0_i32_0 = arith.constant 0 : i32
    %c0_i32_1 = arith.constant 0 : i32
    return %c0_i32, %c0_i32_0 : i32, i32
  }
  func.func @transform_7(%arg0: i32) -> (i32, i32) {
    %c0_i32 = arith.constant 0 : i32
    %c0_i32_0 = arith.constant 0 : i32
    %c0_i32_1 = arith.constant 0 : i32
    return %c0_i32, %c0_i32_0 : i32, i32
  }
  func.func @transform_8(%arg0: i32) -> (i32, i32) {
    %c0_i32 = arith.constant 0 : i32
    %c0_i32_0 = arith.constant 0 : i32
    %c0_i32_1 = arith.constant 0 : i32
    return %c0_i32, %c0_i32_0 : i32, i32
  }
  func.func @transform_9(%arg0: i32) -> (i32, i32) {
    %c0_i32 = arith.constant 0 : i32
    %c0_i32_0 = arith.constant 0 : i32
    %c0_i32_1 = arith.constant 0 : i32
    return %c0_i32, %c0_i32_0 : i32, i32
  }
  func.func @transform_10(%arg0: i32) -> (i32, i32) {
    %c0_i32 = arith.constant 0 : i32
    %c0_i32_0 = arith.constant 0 : i32
    %c0_i32_1 = arith.constant 0 : i32
    return %c0_i32, %c0_i32_0 : i32, i32
  }
  func.func @transform_11(%arg0: i32) -> (i32, i32) {
    %c0_i32 = arith.constant 0 : i32
    %c0_i32_0 = arith.constant 0 : i32
    %c0_i32_1 = arith.constant 0 : i32
    return %c0_i32, %c0_i32_0 : i32, i32
  }
  func.func @transform_12(%arg0: i32) -> (i32, i32) {
    %c0_i32 = arith.constant 0 : i32
    %c0_i32_0 = arith.constant 0 : i32
    return %arg0, %c0_i32 : i32, i32
  }
  func.func @transform_13(%arg0: i32) -> (i32, i32) {
    %c0_i32 = arith.constant 0 : i32
    %c0_i32_0 = arith.constant 0 : i32
    return %arg0, %c0_i32 : i32, i32
  }
}

</mosaic_0001>

<bundles_post_ra>
// kernel: distributional_dqn_forward.1
= control target key start
LH: loop header
LB: loop body
LE: loop exit
PB: predicated region body
PF: predicated region fallthrough
CT: control target
= control target key end

     0   :  { %s2938_s25 = smov 0   ;;  %s3970_s0 = inlined_call_operand.vmem [shape: f32[256,24], index: 0, kind: input, shape index: {}]   ;;  %s3971_s1 = inlined_call_operand.vmem [shape: bf16[24,256], index: 1, kind: input, shape index: {}]   ;;  %s3972_s2 = inlined_call_operand.vmem [shape: f32[1,256], index: 2, kind: input, shape index: {}]   ;;  %s3973_s3 = inlined_call_operand.vmem [shape: bf16[256,256], index: 3, kind: input, shape index: {}]   ;;  %s3974_s4 = inlined_call_operand.vmem [shape: f32[1,256], index: 4, kind: input, shape index: {}]   ;;  %s3975_s5 = inlined_call_operand.vmem [shape: bf16[256,128], index: 5, kind: input, shape index: {}]   ;;  %s3976_s6 = inlined_call_operand.vmem [shape: f32[1,128], index: 6, kind: input, shape index: {}]   ;;  %s3977_s7 = inlined_call_operand.vmem [shape: bf16[128,256], index: 7, kind: input, shape index: {}]   ;;  %s3978_s8 = inlined_call_operand.vmem [shape: f32[1,256], index: 8, kind: input, shape index: {}]   ;;  %s3979_s9 = inlined_call_operand.vmem [shape: f32[256,128], index: 9, kind: input, shape index: {}]   ;;  %s3980_s10 = inlined_call_operand.vmem [shape: f32[128,256], index: 10, kind: input, shape index: {}]   ;;  %s3981_s11 = inlined_call_operand.vmem [shape: f32[1,128], index: 11, kind: input, shape index: {}]   ;;  %s3982_s12 = inlined_call_operand.vmem [shape: f32[256,128], index: 12, kind: output, shape index: {0}]   ;;  %s3983_s13 = inlined_call_operand.vmem [shape: f32[256,256], index: 13, kind: output, shape index: {1}]  }
   0x1 LB: > { %s2339_s26 = sadd.s32 4294967295, %s2863_s25   ;;  %p2343_p0 = scmp.ge.s32.totalorder %s2863_s25, 1  ;;  %s2863_s25 = sphi %s2938_s25, %s24_s25  }
   0x2   : > { %p391_p1 = scmp.lt.s32.totalorder %s2863_s25, 3 }
   0x4   : > { %p392_p2 = pnand %p2343_p0, %p391_p1 }
   0x5   : > { %v2668_v0 = vld [vmem:[%s3971_s1 + $0x4] ss:$8 sps:$4 sm:$0xff] (!%p392_p2)   ;;  %v2670_v1 = vld [vmem:[%s3971_s1] ss:$8 sps:$4 sm:$0xff] (!%p392_p2)   ;;  %v487_v2 = vld [vmem:[%s3971_s1 + $0x10] sm:$0xff] (!%p392_p2)  ;;  %vm540_vm0 = vcmask (!%p392_p2), 1043456  }
   0x6   : > { %395 = sbr.rel (%p392_p2) target bundleno = 1568 (0x620), region = 68  ;;  %v2865_v3 = vmov (!%p392_p2), 0   ;;  %s2344_s16 = sshll.u32 (!%p392_p2), %s2339_s26, 4  ;;  %547 = vmatprep.subr.bf16.mxu0 (!%p392_p2), %v2668_v0  ;;  %v2354_v4 = vcombine.high (!%p392_p2), %v487_v2, %v487_v2  ;;  %v2353_v5 = vcombine.low (!%p392_p2), %v487_v2, %v487_v2  ;;  %v2673_v6 = vld [vmem:[%s3973_s3 + $0x4] ss:$8 sps:$4 sm:$0xff] (!%p392_p2)   ;;  %vm515_vm1 = vcmask (!%p392_p2), 195584  }
   0x7   : > { %579 = vmatprep.mubr.bf16.mxu0 (!%p392_p2), %v2865_v3  ;;  %p442_p3 = scmp.lt.s32.totalorder (!%p392_p2), %s2344_s16, 31  ;;  %v2675_v7 = vld [vmem:[%s3973_s3] ss:$8 sps:$4 sm:$0xff] (!%p392_p2)   ;;  %548 = vmatpush1.bf16.msra.mxu0 (!%p392_p2), %v2670_v1  ;;  %v2676_v8 = vld [vmem:[%s3973_s3 + $0x14] ss:$8 sps:$4 sm:$0xff] (!%p392_p2)   ;;  %s2867_s23 = smov (!%p392_p2), 64  }
   0x8   : > { %2355 = vmatprep.subr.msk.bf16.mxu0 (!%p392_p2), %vm540_vm0, %v2354_v4  ;;  %v542_v9 = vsel (!%p392_p2), %vm540_vm0, %v2353_v5, 0  ;;  %912 = vmatprep.subr.bf16.mxu1 (!%p392_p2), %v2673_v6  ;;  %v2678_v10 = vld [vmem:[%s3973_s3 + $0x10] ss:$8 sps:$4 sm:$0xff] (!%p392_p2)   ;;  %v2679_v11 = vld [vmem:[%s3973_s3 + $0x24] ss:$8 sps:$4 sm:$0xff] (!%p392_p2)  }
   0x9   : > { %913 = vmatpush1.bf16.msra.mxu1 (!%p392_p2), %v2675_v7  ;;  %v2681_v15 = vld [vmem:[%s3973_s3 + $0x20] ss:$8 sps:$4 sm:$0xff] (!%p392_p2)   ;;  %v2682_v16 = vld [vmem:[%s3973_s3 + $0x34] ss:$8 sps:$4 sm:$0xff] (!%p392_p2)   ;;  %v2684_v19 = vld [vmem:[%s3973_s3 + $0x30] ss:$8 sps:$4 sm:$0xff] (!%p392_p2)  }
   0xa   : > { %914 = vmatprep.subr.bf16.mxu1 (!%p392_p2), %v2676_v8  ;;  %v2685_v20 = vld [vmem:[%s3973_s3 + $0x44] ss:$8 sps:$4 sm:$0xff] (!%p392_p2)   ;;  %v2687_v22 = vld [vmem:[%s3973_s3 + $0x40] ss:$8 sps:$4 sm:$0xff] (!%p392_p2)   ;;  %v2688_v23 = vld [vmem:[%s3973_s3 + $0x54] ss:$8 sps:$4 sm:$0xff] (!%p392_p2)  }
   0xb   : > { %550 = vmatpush1.bf16.msra.mxu0 (!%p392_p2), %v542_v9  ;;  %v2690_v26 = vld [vmem:[%s3973_s3 + $0x50] ss:$8 sps:$4 sm:$0xff] (!%p392_p2)   ;;  %v2691_v27 = vld [vmem:[%s3973_s3 + $0x64] ss:$8 sps:$4 sm:$0xff] (!%p392_p2)   ;;  %v2693_v29 = vld [vmem:[%s3973_s3 + $0x60] ss:$8 sps:$4 sm:$0xff] (!%p392_p2)  }
   0xc   : > { %v2694_v30 = vld [vmem:[%s3973_s3 + $0x74] ss:$8 sps:$4 sm:$0xff] (!%p392_p2)   ;;  %v2696_v33 = vld [vmem:[%s3973_s3 + $0x70] ss:$8 sps:$4 sm:$0xff] (!%p392_p2)   ;;  %v2697_v34 = vld [vmem:[%s3973_s3 + $0x84] ss:$8 sps:$4 sm:$0xff] (!%p392_p2)  }
   0xd   : > { %s3985_s16 = smov (!%p442_p3, %s2344_s16), 31  ;;  %915 = vmatpush1.bf16.msra.mxu1 %v2678_v10  ;;  %v2699_v36 = vld [vmem:[%s3973_s3 + $0x80] ss:$8 sps:$4 sm:$0xff]   ;;  %v2700_v37 = vld [vmem:[%s3973_s3 + $0x94] ss:$8 sps:$4 sm:$0xff]  }
   0xe   : > { %s2345_s26 = sshll.u32 %s3985_s16, 3  ;;  %916 = vmatprep.subr.bf16.mxu1 %v2679_v11  ;;  %v2702_v40 = vld [vmem:[%s3973_s3 + $0x90] ss:$8 sps:$4 sm:$0xff]   ;;  %v2703_v41 = vld [vmem:[%s3973_s3 + $0xa4] ss:$8 sps:$4 sm:$0xff]  }
   0xf   : > { %s2979_s14 = scalar_lea.vmem %s3970_s0, %s2345_s26  ;;  %v2705_v43 = vld [vmem:[%s3973_s3 + $0xa0] ss:$8 sps:$4 sm:$0xff]   ;;  %v2706_v44 = vld [vmem:[%s3973_s3 + $0xb4] ss:$8 sps:$4 sm:$0xff]   ;;  %v2708_v47 = vld [vmem:[%s3973_s3 + $0xb0] ss:$8 sps:$4 sm:$0xff]   ;;  %s3868_s28 = scalar_lea.vmem %s3982_s12, %s2345_s26 }
  0x10   : > { %v461_v12 = vld [vmem:[%s2979_s14] sm:$0xff]  ;;  %v462_v13 = vld [vmem:[%s2979_s14 + $0x8] sm:$0xff]  ;;  %v463_v17 = vld [vmem:[%s2979_s14 + $0x10] sm:$0xff]  ;;  %s2432_s26 = sshll.u32 %s3985_s16, 4 }
  0x11   : > { %v477_v14 = vpack.c.bf16 %v462_v13, %v461_v12  ;;  %v464_v18 = vld [vmem:[%s2979_s14 + $0x18] sm:$0xff]  ;;  %917 = vmatpush1.bf16.msra.mxu1 %v2681_v15  ;;  %v465_v24 = vld [vmem:[%s2979_s14 + $0x20] sm:$0xff]  ;;  %v466_v25 = vld [vmem:[%s2979_s14 + $0x28] sm:$0xff]  ;;  %s3901_s30 = scalar_lea.vmem %s3983_s13, %s2432_s26 }
  0x12   : > { %918 = vmatprep.subr.bf16.mxu1 %v2682_v16  ;;  %v478_v21 = vpack.c.bf16 %v464_v18, %v463_v17  ;;  %v479_v28 = vpack.c.bf16 %v466_v25, %v465_v24  ;;  %v467_v31 = vld [vmem:[%s2979_s14 + $0x30] sm:$0xff]  ;;  %v468_v32 = vld [vmem:[%s2979_s14 + $0x38] sm:$0xff]  ;;  %v469_v38 = vld [vmem:[%s2979_s14 + $0x40] sm:$0xff] }
  0x13   : > { %2356 = vmatmul.mubr.msk.bf16.vlgmr.msra.gmra.mrb[0].mxu0 %vm515_vm1, %v477_v14  ;;  %v480_v35 = vpack.c.bf16 %v468_v32, %v467_v31  ;;  %v470_v39 = vld [vmem:[%s2979_s14 + $0x48] sm:$0xff]  ;;  %v471_v45 = vld [vmem:[%s2979_s14 + $0x50] sm:$0xff]  ;;  %v472_v46 = vld [vmem:[%s2979_s14 + $0x58] sm:$0xff]  ;;  %v490_v14 = vlaneseq }
  0x14   : > { %589 = vmatprep.mubr.bf16.mxu0 %v2865_v3  ;;  %v481_v42 = vpack.c.bf16 %v470_v39, %v469_v38  ;;  %v2709_v48 = vld [vmem:[%s3973_s3 + $0xc4] ss:$8 sps:$4 sm:$0xff]   ;;  %v482_v49 = vpack.c.bf16 %v472_v46, %v471_v45  ;;  %v2711_v50 = vld [vmem:[%s3973_s3 + $0xc0] ss:$8 sps:$4 sm:$0xff]   ;;  %v2712_v51 = vld [vmem:[%s3973_s3 + $0xd4] ss:$8 sps:$4 sm:$0xff]  }
  0x15   : > { %919 = vmatpush1.bf16.msra.mxu1 %v2684_v19  ;;  %v473_v52 = vld [vmem:[%s2979_s14 + $0x60] sm:$0xff]  ;;  %v474_v53 = vld [vmem:[%s2979_s14 + $0x68] sm:$0xff]  ;;  %v475_v55 = vld [vmem:[%s2979_s14 + $0x70] sm:$0xff]  ;;  %v491_v15 = vshrl.u32 %v490_v14, 7 }
  0x16   : > { %920 = vmatprep.subr.bf16.mxu1 %v2685_v20  ;;  %v483_v54 = vpack.c.bf16 %v474_v53, %v473_v52  ;;  %v476_v56 = vld [vmem:[%s2979_s14 + $0x78] sm:$0xff]  ;;  %v2715_v59 = vld [vmem:[%s3973_s3 + $0xe4] ss:$8 sps:$4 sm:$0xff]   ;;  %v2717_v60 = vld [vmem:[%s3973_s3 + $0xe0] ss:$8 sps:$4 sm:$0xff]  }
  0x17   : > { %v484_v57 = vpack.c.bf16 %v476_v56, %v475_v55  ;;  %v2714_v58 = vld [vmem:[%s3973_s3 + $0xd0] ss:$8 sps:$4 sm:$0xff]   ;;  %v2718_v61 = vld [vmem:[%s3973_s3 + $0xf4] ss:$8 sps:$4 sm:$0xff]   ;;  %v2721_v63 = vld [vmem:[%s3975_s5 + $0x40] sm:$0xff]   ;;  %v3135_v16 = vsub.s32 0, %v491_v15 }
  0x18   : > { %v2720_v62 = vld [vmem:[%s3973_s3 + $0xf0] ss:$8 sps:$4 sm:$0xff]   ;;  %v2722_v0 = vld [vmem:[%s3975_s5] sm:$0xff]   ;;  %v2723_v1 = vld [vmem:[%s3975_s5 + $0x48] sm:$0xff]   ;;  %2433 = vmatprep.subr.bf16.mxu0 %v2721_v63  ;;  %v3140_v18 = vsub.s32 1, %v491_v15 }
  0x19   : > { %921 = vmatpush1.bf16.msra.mxu1 %v2687_v22  ;;  %2434 = vmatpush3.bf16.msra.mxu0 %v2722_v0  ;;  %v2724_v2 = vld [vmem:[%s3975_s5 + $0x8] sm:$0xff]   ;;  %v2725_v4 = vld [vmem:[%s3975_s5 + $0x50] sm:$0xff]   ;;  %v2727_v6 = vld [vmem:[%s3975_s5 + $0x58] sm:$0xff]  }
  0x1a   : > { %922 = vmatprep.subr.bf16.mxu1 %v2688_v23  ;;  %2435 = vmatprep.subr.bf16.mxu0 %v2723_v1  ;;  %v2726_v5 = vld [vmem:[%s3975_s5 + $0x10] sm:$0xff]   ;;  %v2728_v7 = vld [vmem:[%s3975_s5 + $0x18] sm:$0xff]   ;;  %v2729_v8 = vld [vmem:[%s3975_s5 + $0x60] sm:$0xff]  }
  0x1b   : > { %2357 = vmatmul.mubr.msk.bf16.gmra.mrb[4].mxu0 %vm515_vm1, %v478_v21  ;;  %v2730_v9 = vld [vmem:[%s3975_s5 + $0x20] sm:$0xff]   ;;  %v2731_v10 = vld [vmem:[%s3975_s5 + $0x68] sm:$0xff]   ;;  %v2733_v12 = vld [vmem:[%s3975_s5 + $0x70] sm:$0xff]  }
  0x1c   : > { %599 = vmatprep.mubr.bf16.mxu0 %v2865_v3  ;;  %v2732_v11 = vld [vmem:[%s3975_s5 + $0x28] sm:$0xff]   ;;  %v2734_v13 = vld [vmem:[%s3975_s5 + $0x30] sm:$0xff]   ;;  %v488_v17 = vld [vmem:[%s3972_s2] sm:$0x3] }
  0x1d   : > { %923 = vmatpush1.bf16.msra.mxu1 %v2690_v26  ;;  %2436 = vmatpush3.bf16.msra.mxu0 %v2724_v2  ;;  %v3143_v19 = vrot.slane %v488_v17, %v3135_v16  ;;  %v3146_v20 = vrot.slane %v488_v17, %v3140_v18 }
  0x1e   : > { %924 = vmatprep.subr.bf16.mxu1 %v2691_v27  ;;  %2437 = vmatprep.subr.bf16.mxu0 %v2725_v4 }
  0x21   : > { %925 = vmatpush1.bf16.msra.mxu1 %v2693_v29  ;;  %2438 = vmatpush3.bf16.msra.mxu0 %v2726_v5 }
  0x22   : > { %926 = vmatprep.subr.bf16.mxu1 %v2694_v30  ;;  %2439 = vmatprep.subr.bf16.mxu0 %v2727_v6 }
  0x23   : > { %2358 = vmatmul.mubr.msk.bf16.gmra.mrb[8].mxu0 %vm515_vm1, %v479_v28 }
  0x24   : > { %609 = vmatprep.mubr.bf16.mxu0 %v2865_v3 }
  0x25   : > { %927 = vmatpush1.bf16.msra.mxu1 %v2696_v33  ;;  %2440 = vmatpush3.bf16.msra.mxu0 %v2728_v7 }
  0x26   : > { %928 = vmatprep.subr.bf16.mxu1 %v2697_v34  ;;  %2441 = vmatprep.subr.bf16.mxu0 %v2729_v8 }
  0x29   : > { %929 = vmatpush1.bf16.msra.mxu1 %v2699_v36  ;;  %2442 = vmatpush3.bf16.msra.mxu0 %v2730_v9 }
  0x2a   : > { %930 = vmatprep.subr.bf16.mxu1 %v2700_v37  ;;  %2443 = vmatprep.subr.bf16.mxu0 %v2731_v10 }
  0x2b   : > { %2359 = vmatmul.mubr.msk.bf16.gmra.mrb[12].mxu0 %vm515_vm1, %v480_v35 }
  0x2c   : > { %619 = vmatprep.mubr.bf16.mxu0 %v2865_v3 }
  0x2d   : > { %931 = vmatpush1.bf16.msra.mxu1 %v2702_v40  ;;  %2444 = vmatpush3.bf16.msra.mxu0 %v2732_v11 }
  0x2e   : > { %932 = vmatprep.subr.bf16.mxu1 %v2703_v41  ;;  %2445 = vmatprep.subr.bf16.mxu0 %v2733_v12 }
  0x31   : > { %933 = vmatpush1.bf16.msra.mxu1 %v2705_v43  ;;  %2446 = vmatpush3.bf16.msra.mxu0 %v2734_v13 }
  0x32   : > { %934 = vmatprep.subr.bf16.mxu1 %v2706_v44 }
  0x33   : > { %2360 = vmatmul.mubr.msk.bf16.gmra.mrb[16].mxu0 %vm515_vm1, %v481_v42 }
  0x34   : > { %629 = vmatprep.mubr.bf16.mxu0 %v2865_v3 }
  0x35   : > { %935 = vmatpush1.bf16.msra.mxu1 %v2708_v47 }
  0x36   : > { %936 = vmatprep.subr.bf16.mxu1 %v2709_v48 }
  0x39   : > { %937 = vmatpush1.bf16.msra.mxu1 %v2711_v50 }
  0x3a   : > { %938 = vmatprep.subr.bf16.mxu1 %v2712_v51 }
  0x3b   : > { %2361 = vmatmul.mubr.msk.bf16.gmra.mrb[20].mxu0 %vm515_vm1, %v482_v49 }
  0x3c   : > { %639 = vmatprep.mubr.bf16.mxu0 %v2865_v3 }
  0x3d   : > { %939 = vmatpush1.bf16.msra.mxu1 %v2714_v58 }
  0x3e   : > { %940 = vmatprep.subr.bf16.mxu1 %v2715_v59 }
  0x41   : > { %941 = vmatpush1.bf16.msra.mxu1 %v2717_v60 }
  0x42   : > { %942 = vmatprep.subr.bf16.mxu1 %v2718_v61 }
  0x43   : > { %2362 = vmatmul.mubr.msk.bf16.gmra.mrb[24].mxu0 %vm515_vm1, %v483_v54 }
  0x44   : > { %649 = vmatprep.mubr.bf16.mxu0 %v2865_v3 }
  0x45   : > { %943 = vmatpush1.bf16.msra.mxu1 %v2720_v62 }
  0x4b   : > { %2363 = vmatmul.mubr.msk.bf16.gmra.mrb[28].mxu0 %vm515_vm1, %v484_v57 }
  0xe6   : > { %v581_v21 = vpop.f32.mrb[0].mxu0 }
  0xe7   : > { %v582_v22 = vadd.f32 %v581_v21, %v3143_v19  ;;  %v583_v23 = vpop.f32.mrb[1].mxu0 }
  0xe8   : > { %v584_v24 = vadd.f32 %v583_v23, %v3146_v20  ;;  %v585_v25 = vpop.f32.mrb[2].mxu0 }
  0xe9   : > { %v586_v26 = vadd.f32 %v585_v25, %v3143_v19  ;;  %v587_v27 = vpop.f32.mrb[3].mxu0  ;;  %v660_v29 = vmax.f32 %v582_v22, 0.0 }
  0xea   : > { %v588_v28 = vadd.f32 %v587_v27, %v3146_v20  ;;  %v661_v31 = vmax.f32 %v584_v24, 0.0 }
  0xeb   : > { %v662_v30 = vmax.f32 %v586_v26, 0.0 }
  0xec   : > { %v663_v32 = vmax.f32 %v588_v28, 0.0 }
  0xed   : > { %v692_v33 = vpack.c.bf16 %v662_v30, %v660_v29 }
  0xee   : > { %v591_v34 = vpop.f32.mrb[4].mxu0  ;;  %v693_v35 = vpack.c.bf16 %v663_v32, %v661_v31 }
  0xef   : > { %v592_v36 = vadd.f32 %v591_v34, %v3143_v19  ;;  %v593_v37 = vpop.f32.mrb[5].mxu0 }
  0xf0   : > { %v594_v38 = vadd.f32 %v593_v37, %v3146_v20  ;;  %v595_v39 = vpop.f32.mrb[6].mxu0  ;;  %944 = vmatprep.mubr.bf16.mxu1 %v693_v35 }
  0xf1   : > { %v596_v40 = vadd.f32 %v595_v39, %v3143_v19  ;;  %v597_v41 = vpop.f32.mrb[7].mxu0  ;;  %945 = vmatmul.mubr.bf16.vlgmr.msra.gmra.mrb[0].mxu1 %v692_v33  ;;  %v664_v43 = vmax.f32 %v592_v36, 0.0 }
  0xf2   : > { %v598_v42 = vadd.f32 %v597_v41, %v3146_v20  ;;  %v665_v45 = vmax.f32 %v594_v38, 0.0 }
  0xf3   : > { %v666_v44 = vmax.f32 %v596_v40, 0.0 }
  0xf4   : > { %v667_v46 = vmax.f32 %v598_v42, 0.0 }
  0xf5   : > { %v694_v47 = vpack.c.bf16 %v666_v44, %v664_v43 }
  0xf6   : > { %v695_v48 = vpack.c.bf16 %v667_v46, %v665_v45  ;;  %v601_v49 = vpop.f32.mrb[8].mxu0 }
  0xf7   : > { %v602_v50 = vadd.f32 %v601_v49, %v3143_v19  ;;  %v603_v51 = vpop.f32.mrb[9].mxu0 }
  0xf8   : > { %v604_v52 = vadd.f32 %v603_v51, %v3146_v20  ;;  %v605_v53 = vpop.f32.mrb[10].mxu0  ;;  %954 = vmatprep.mubr.bf16.mxu1 %v695_v48 }
  0xf9   : > { %v606_v54 = vadd.f32 %v605_v53, %v3143_v19  ;;  %v607_v55 = vpop.f32.mrb[11].mxu0  ;;  %955 = vmatmul.mubr.bf16.gmra.mrb[4].mxu1 %v694_v47  ;;  %v668_v57 = vmax.f32 %v602_v50, 0.0 }
  0xfa   : > { %v608_v56 = vadd.f32 %v607_v55, %v3146_v20  ;;  %v669_v59 = vmax.f32 %v604_v52, 0.0 }
  0xfb   : > { %v670_v58 = vmax.f32 %v606_v54, 0.0 }
  0xfc   : > { %v671_v60 = vmax.f32 %v608_v56, 0.0 }
  0xfd   : > { %v696_v61 = vpack.c.bf16 %v670_v58, %v668_v57 }
  0xfe   : > { %v697_v62 = vpack.c.bf16 %v671_v60, %v669_v59  ;;  %v611_v63 = vpop.f32.mrb[12].mxu0 }
  0xff   : > { %v612_v0 = vadd.f32 %v611_v63, %v3143_v19  ;;  %v613_v1 = vpop.f32.mrb[13].mxu0 }
 0x100   : > { %v614_v2 = vadd.f32 %v613_v1, %v3146_v20  ;;  %v615_v4 = vpop.f32.mrb[14].mxu0  ;;  %964 = vmatprep.mubr.bf16.mxu1 %v697_v62 }
 0x101   : > { %v616_v5 = vadd.f32 %v615_v4, %v3143_v19  ;;  %v617_v6 = vpop.f32.mrb[15].mxu0  ;;  %965 = vmatmul.mubr.bf16.gmra.mrb[8].mxu1 %v696_v61  ;;  %v672_v8 = vmax.f32 %v612_v0, 0.0 }
 0x102   : > { %v618_v7 = vadd.f32 %v617_v6, %v3146_v20  ;;  %v673_v10 = vmax.f32 %v614_v2, 0.0 }
 0x103   : > { %v674_v9 = vmax.f32 %v616_v5, 0.0 }
 0x104   : > { %v675_v11 = vmax.f32 %v618_v7, 0.0 }
 0x105   : > { %v698_v12 = vpack.c.bf16 %v674_v9, %v672_v8 }
 0x106   : > { %v699_v13 = vpack.c.bf16 %v675_v11, %v673_v10  ;;  %v621_v14 = vpop.f32.mrb[16].mxu0  ;;  %v2735_v11 = vld [vmem:[%s3975_s5 + $0x78] sm:$0xff]  }
 0x107   : > { %v622_v15 = vadd.f32 %v621_v14, %v3143_v19  ;;  %v623_v17 = vpop.f32.mrb[17].mxu0  ;;  %2447 = vmatprep.subr.bf16.mxu0 %v2735_v11  ;;  %v2740_v14 = vld [vmem:[%s3977_s7 + $0x10] ss:$8 sps:$4 sm:$0xff]  }
 0x108   : > { %v624_v21 = vadd.f32 %v623_v17, %v3146_v20  ;;  %v625_v22 = vpop.f32.mrb[18].mxu0  ;;  %974 = vmatprep.mubr.bf16.mxu1 %v699_v13  ;;  %v2742_v13 = vld [vmem:[%s3977_s7 + $0x14] ss:$8 sps:$4 sm:$0xff]   ;;  %v2743_v17 = vld [vmem:[%s3977_s7 + $0x20] ss:$8 sps:$4 sm:$0xff]  }
 0x109   : > { %v626_v23 = vadd.f32 %v625_v22, %v3143_v19  ;;  %v627_v24 = vpop.f32.mrb[19].mxu0  ;;  %975 = vmatmul.mubr.bf16.gmra.mrb[12].mxu1 %v698_v12  ;;  %v676_v26 = vmax.f32 %v622_v15, 0.0  ;;  %v2739_v12 = vld [vmem:[%s3977_s7 + $0x4] ss:$8 sps:$4 sm:$0xff]   ;;  %v2746_v22 = vld [vmem:[%s3977_s7 + $0x30] ss:$8 sps:$4 sm:$0xff]  }
 0x10a   : > { %v628_v25 = vadd.f32 %v627_v24, %v3146_v20  ;;  %v677_v28 = vmax.f32 %v624_v21, 0.0  ;;  %1437 = vmatprep.subr.bf16.mxu1 %v2739_v12  ;;  %v2745_v15 = vld [vmem:[%s3977_s7 + $0x24] ss:$8 sps:$4 sm:$0xff]   ;;  %v2748_v21 = vld [vmem:[%s3977_s7 + $0x34] ss:$8 sps:$4 sm:$0xff]  }
 0x10b   : > { %v678_v27 = vmax.f32 %v626_v23, 0.0  ;;  %v2751_v23 = vld [vmem:[%s3977_s7 + $0x44] ss:$8 sps:$4 sm:$0xff]   ;;  %v2749_v24 = vld [vmem:[%s3977_s7 + $0x40] ss:$8 sps:$4 sm:$0xff]  }
 0x10c   : > { %v679_v29 = vmax.f32 %v628_v25, 0.0  ;;  %v2754_v25 = vld [vmem:[%s3977_s7 + $0x54] ss:$8 sps:$4 sm:$0xff]  }
 0x10d   : > { %v700_v30 = vpack.c.bf16 %v678_v27, %v676_v26  ;;  %v2752_v26 = vld [vmem:[%s3977_s7 + $0x50] ss:$8 sps:$4 sm:$0xff]   ;;  %v2757_v27 = vld [vmem:[%s3977_s7 + $0x64] ss:$8 sps:$4 sm:$0xff]  }
 0x10e   : > { %v701_v31 = vpack.c.bf16 %v679_v29, %v677_v28  ;;  %v631_v32 = vpop.f32.mrb[20].mxu0  ;;  %v2755_v28 = vld [vmem:[%s3977_s7 + $0x60] ss:$8 sps:$4 sm:$0xff]  }
 0x10f   : > { %v632_v33 = vadd.f32 %v631_v32, %v3143_v19  ;;  %v633_v34 = vpop.f32.mrb[21].mxu0  ;;  %v740_v29 = vld [vmem:[%s3974_s4] sm:$0x3] }
 0x110   : > { %v634_v35 = vadd.f32 %v633_v34, %v3146_v20  ;;  %v635_v36 = vpop.f32.mrb[22].mxu0  ;;  %984 = vmatprep.mubr.bf16.mxu1 %v701_v31  ;;  %v3236_v31 = vrot.slane %v740_v29, %v3140_v18 }
 0x111   : > { %v636_v37 = vadd.f32 %v635_v36, %v3143_v19  ;;  %v637_v38 = vpop.f32.mrb[23].mxu0  ;;  %985 = vmatmul.mubr.bf16.gmra.mrb[16].mxu1 %v700_v30  ;;  %v680_v40 = vmax.f32 %v632_v33, 0.0  ;;  %v3233_v30 = vrot.slane %v740_v29, %v3135_v16 }
 0x112   : > { %v638_v39 = vadd.f32 %v637_v38, %v3146_v20  ;;  %v681_v42 = vmax.f32 %v634_v35, 0.0 }
 0x113   : > { %v682_v41 = vmax.f32 %v636_v37, 0.0 }
 0x114   : > { %v683_v43 = vmax.f32 %v638_v39, 0.0 }
 0x115   : > { %v702_v44 = vpack.c.bf16 %v682_v41, %v680_v40 }
 0x116   : > { %v703_v45 = vpack.c.bf16 %v683_v43, %v681_v42  ;;  %v641_v46 = vpop.f32.mrb[24].mxu0 }
 0x117   : > { %v642_v47 = vadd.f32 %v641_v46, %v3143_v19  ;;  %v643_v48 = vpop.f32.mrb[25].mxu0 }
 0x118   : > { %v644_v49 = vadd.f32 %v643_v48, %v3146_v20  ;;  %v645_v50 = vpop.f32.mrb[26].mxu0  ;;  %994 = vmatprep.mubr.bf16.mxu1 %v703_v45 }
 0x119   : > { %v646_v51 = vadd.f32 %v645_v50, %v3143_v19  ;;  %v647_v52 = vpop.f32.mrb[27].mxu0  ;;  %995 = vmatmul.mubr.bf16.gmra.mrb[20].mxu1 %v702_v44  ;;  %v684_v54 = vmax.f32 %v642_v47, 0.0 }
 0x11a   : > { %v648_v53 = vadd.f32 %v647_v52, %v3146_v20  ;;  %v685_v56 = vmax.f32 %v644_v49, 0.0 }
 0x11b   : > { %v686_v55 = vmax.f32 %v646_v51, 0.0 }
 0x11c   : > { %v687_v57 = vmax.f32 %v648_v53, 0.0 }
 0x11d   : > { %v704_v58 = vpack.c.bf16 %v686_v55, %v684_v54 }
 0x11e   : > { %v705_v59 = vpack.c.bf16 %v687_v57, %v685_v56  ;;  %v651_v60 = vpop.f32.mrb[28].mxu0 }
 0x11f   : > { %v652_v61 = vadd.f32 %v651_v60, %v3143_v19  ;;  %v653_v62 = vpop.f32.mrb[29].mxu0 }
 0x120   : > { %v654_v63 = vadd.f32 %v653_v62, %v3146_v20  ;;  %v655_v0 = vpop.f32.mrb[30].mxu0  ;;  %1004 = vmatprep.mubr.bf16.mxu1 %v705_v59 }
 0x121   : > { %v656_v1 = vadd.f32 %v655_v0, %v3143_v19  ;;  %v657_v2 = vpop.f32.mrb[31].mxu0  ;;  %1005 = vmatmul.mubr.bf16.gmra.mrb[24].mxu1 %v704_v58  ;;  %v688_v5 = vmax.f32 %v652_v61, 0.0  ;;  %v2736_v19 = vld [vmem:[%s3975_s5 + $0x38] sm:$0xff]  }
 0x122   : > { %v658_v4 = vadd.f32 %v657_v2, %v3146_v20  ;;  %v689_v7 = vmax.f32 %v654_v63, 0.0  ;;  %2448 = vmatpush3.bf16.msra.mxu0 %v2736_v19  ;;  %v2737_v20 = vld [vmem:[%s3977_s7] ss:$8 sps:$4 sm:$0xff]  }
 0x123   : > { %v690_v6 = vmax.f32 %v656_v1, 0.0  ;;  %1438 = vmatpush1.bf16.msra.mxu1 %v2737_v20 }
 0x124   : > { %v691_v8 = vmax.f32 %v658_v4, 0.0  ;;  %1439 = vmatprep.subr.bf16.mxu1 %v2742_v13 }
 0x125   : > { %v706_v9 = vpack.c.bf16 %v690_v6, %v688_v5 }
 0x126   : > { %v707_v10 = vpack.c.bf16 %v691_v8, %v689_v7 }
 0x127   : > { %1440 = vmatpush1.bf16.msra.mxu1 %v2740_v14 }
 0x128   : > { %1014 = vmatprep.mubr.bf16.mxu1 %v707_v10  ;;  %1441 = vmatprep.subr.bf16.mxu1 %v2745_v15 }
 0x129   : > { %1015 = vmatmul.mubr.bf16.gmra.mrb[28].mxu1 %v706_v9 }
 0x12a   : > { %1469 = vmatprep.mubr.bf16.mxu1 %v2865_v3 }
 0x12b   : > { %1442 = vmatpush1.bf16.msra.mxu1 %v2743_v17 }
 0x12c   : > { %1443 = vmatprep.subr.bf16.mxu1 %v2748_v21 }
 0x12f   : > { %1444 = vmatpush1.bf16.msra.mxu1 %v2746_v22 }
 0x130   : > { %1445 = vmatprep.subr.bf16.mxu1 %v2751_v23 }
 0x133   : > { %1446 = vmatpush1.bf16.msra.mxu1 %v2749_v24 }
 0x134   : > { %1447 = vmatprep.subr.bf16.mxu1 %v2754_v25 }
 0x137   : > { %1448 = vmatpush1.bf16.msra.mxu1 %v2752_v26 }
 0x138   : > { %1449 = vmatprep.subr.bf16.mxu1 %v2757_v27 }
 0x13b   : > { %1450 = vmatpush1.bf16.msra.mxu1 %v2755_v28 }
 0x1c4   : > { %v946_v32 = vpop.f32.mrb[0].mxu1 }
 0x1c5   : > { %v947_v33 = vadd.f32 %v946_v32, %v3233_v30  ;;  %v948_v34 = vpop.f32.mrb[1].mxu1 }
 0x1c6   : > { %v949_v35 = vadd.f32 %v948_v34, %v3236_v31  ;;  %v950_v36 = vpop.f32.mrb[2].mxu1 }
 0x1c7   : > { %v951_v37 = vadd.f32 %v950_v36, %v3233_v30  ;;  %v952_v38 = vpop.f32.mrb[3].mxu1  ;;  %v1025_v40 = vmax.f32 %v947_v33, 0.0 }
 0x1c8   : > { %v953_v39 = vadd.f32 %v952_v38, %v3236_v31  ;;  %v1026_v42 = vmax.f32 %v949_v35, 0.0 }
 0x1c9   : > { %v1027_v41 = vmax.f32 %v951_v37, 0.0 }
 0x1ca   : > { %v1028_v43 = vmax.f32 %v953_v39, 0.0 }
 0x1cb   : > { %v1057_v44 = vpack.c.bf16 %v1027_v41, %v1025_v40 }
 0x1cc   : > { %v1058_v45 = vpack.c.bf16 %v1028_v43, %v1026_v42  ;;  %v956_v46 = vpop.f32.mrb[4].mxu1 }
 0x1cd   : > { %v957_v47 = vadd.f32 %v956_v46, %v3233_v30  ;;  %v958_v48 = vpop.f32.mrb[5].mxu1 }
 0x1ce   : > { %v959_v49 = vadd.f32 %v958_v48, %v3236_v31  ;;  %v960_v50 = vpop.f32.mrb[6].mxu1  ;;  %1240 = vmatprep.mubr.bf16.mxu0 %v1058_v45 }
 0x1cf   : > { %v961_v51 = vadd.f32 %v960_v50, %v3233_v30  ;;  %v962_v52 = vpop.f32.mrb[7].mxu1  ;;  %1241 = vmatmul.mubr.bf16.vlgmr.msra.gmra.mrb[32].mxu0 %v1057_v44  ;;  %v1029_v54 = vmax.f32 %v957_v47, 0.0 }
 0x1d0   : > { %v963_v53 = vadd.f32 %v962_v52, %v3236_v31  ;;  %v1030_v56 = vmax.f32 %v959_v49, 0.0 }
 0x1d1   : > { %v1031_v55 = vmax.f32 %v961_v51, 0.0 }
 0x1d2   : > { %v1032_v57 = vmax.f32 %v963_v53, 0.0 }
 0x1d3   : > { %v1059_v58 = vpack.c.bf16 %v1031_v55, %v1029_v54 }
 0x1d4   : > { %v1060_v59 = vpack.c.bf16 %v1032_v57, %v1030_v56  ;;  %v966_v60 = vpop.f32.mrb[8].mxu1 }
 0x1d5   : > { %v967_v61 = vadd.f32 %v966_v60, %v3233_v30  ;;  %v968_v62 = vpop.f32.mrb[9].mxu1 }
 0x1d6   : > { %v969_v63 = vadd.f32 %v968_v62, %v3236_v31  ;;  %v970_v0 = vpop.f32.mrb[10].mxu1  ;;  %1248 = vmatprep.mubr.bf16.mxu0 %v1060_v59 }
 0x1d7   : > { %v971_v1 = vadd.f32 %v970_v0, %v3233_v30  ;;  %v972_v2 = vpop.f32.mrb[11].mxu1  ;;  %1249 = vmatmul.mubr.bf16.gmra.mrb[36].mxu0 %v1059_v58  ;;  %v1033_v5 = vmax.f32 %v967_v61, 0.0 }
 0x1d8   : > { %v973_v4 = vadd.f32 %v972_v2, %v3236_v31  ;;  %v1034_v7 = vmax.f32 %v969_v63, 0.0 }
 0x1d9   : > { %v1035_v6 = vmax.f32 %v971_v1, 0.0 }
 0x1da   : > { %v1036_v8 = vmax.f32 %v973_v4, 0.0 }
 0x1db   : > { %v1061_v9 = vpack.c.bf16 %v1035_v6, %v1033_v5 }
 0x1dc   : > { %v1062_v10 = vpack.c.bf16 %v1036_v8, %v1034_v7  ;;  %v976_v11 = vpop.f32.mrb[12].mxu1 }
 0x1dd   : > { %v977_v19 = vadd.f32 %v976_v11, %v3233_v30  ;;  %v978_v20 = vpop.f32.mrb[13].mxu1 }
 0x1de   : > { %v979_v12 = vadd.f32 %v978_v20, %v3236_v31  ;;  %v980_v13 = vpop.f32.mrb[14].mxu1  ;;  %1256 = vmatprep.mubr.bf16.mxu0 %v1062_v10 }
 0x1df   : > { %v981_v14 = vadd.f32 %v980_v13, %v3233_v30  ;;  %v982_v15 = vpop.f32.mrb[15].mxu1  ;;  %1257 = vmatmul.mubr.bf16.gmra.mrb[40].mxu0 %v1061_v9  ;;  %v1037_v21 = vmax.f32 %v977_v19, 0.0 }
 0x1e0   : > { %v983_v17 = vadd.f32 %v982_v15, %v3236_v31  ;;  %v1038_v23 = vmax.f32 %v979_v12, 0.0 }
 0x1e1   : > { %v1039_v22 = vmax.f32 %v981_v14, 0.0 }
 0x1e2   : > { %v1040_v24 = vmax.f32 %v983_v17, 0.0 }
 0x1e3   : > { %v1063_v25 = vpack.c.bf16 %v1039_v22, %v1037_v21 }
 0x1e4   : > { %v1064_v26 = vpack.c.bf16 %v1040_v24, %v1038_v23  ;;  %v986_v27 = vpop.f32.mrb[16].mxu1  ;;  %v2760_v24 = vld [vmem:[%s3977_s7 + $0x74] ss:$8 sps:$4 sm:$0xff]  }
 0x1e5   : > { %v987_v28 = vadd.f32 %v986_v27, %v3233_v30  ;;  %v988_v29 = vpop.f32.mrb[17].mxu1  ;;  %1451 = vmatprep.subr.bf16.mxu1 %v2760_v24 }
 0x1e6   : > { %v989_v32 = vadd.f32 %v988_v29, %v3236_v31  ;;  %v990_v33 = vpop.f32.mrb[18].mxu1  ;;  %1264 = vmatprep.mubr.bf16.mxu0 %v1064_v26 }
 0x1e7   : > { %v991_v34 = vadd.f32 %v990_v33, %v3233_v30  ;;  %v992_v35 = vpop.f32.mrb[19].mxu1  ;;  %1265 = vmatmul.mubr.bf16.gmra.mrb[44].mxu0 %v1063_v25  ;;  %v1041_v37 = vmax.f32 %v987_v28, 0.0 }
 0x1e8   : > { %v993_v36 = vadd.f32 %v992_v35, %v3236_v31  ;;  %v1042_v39 = vmax.f32 %v989_v32, 0.0 }
 0x1e9   : > { %v1043_v38 = vmax.f32 %v991_v34, 0.0 }
 0x1ea   : > { %v1044_v40 = vmax.f32 %v993_v36, 0.0 }
 0x1eb   : > { %v1065_v41 = vpack.c.bf16 %v1043_v38, %v1041_v37 }
 0x1ec   : > { %v1066_v42 = vpack.c.bf16 %v1044_v40, %v1042_v39  ;;  %v996_v43 = vpop.f32.mrb[20].mxu1 }
 0x1ed   : > { %v997_v44 = vadd.f32 %v996_v43, %v3233_v30  ;;  %v998_v45 = vpop.f32.mrb[21].mxu1 }
 0x1ee   : > { %v999_v46 = vadd.f32 %v998_v45, %v3236_v31  ;;  %v1000_v47 = vpop.f32.mrb[22].mxu1  ;;  %1272 = vmatprep.mubr.bf16.mxu0 %v1066_v42 }
 0x1ef   : > { %v1001_v48 = vadd.f32 %v1000_v47, %v3233_v30  ;;  %v1002_v49 = vpop.f32.mrb[23].mxu1  ;;  %1273 = vmatmul.mubr.bf16.gmra.mrb[48].mxu0 %v1065_v41  ;;  %v1045_v51 = vmax.f32 %v997_v44, 0.0 }
 0x1f0   : > { %v1003_v50 = vadd.f32 %v1002_v49, %v3236_v31  ;;  %v1046_v53 = vmax.f32 %v999_v46, 0.0 }
 0x1f1   : > { %v1047_v52 = vmax.f32 %v1001_v48, 0.0 }
 0x1f2   : > { %v1048_v54 = vmax.f32 %v1003_v50, 0.0 }
 0x1f3   : > { %v1067_v55 = vpack.c.bf16 %v1047_v52, %v1045_v51 }
 0x1f4   : > { %v1068_v56 = vpack.c.bf16 %v1048_v54, %v1046_v53  ;;  %v1006_v57 = vpop.f32.mrb[24].mxu1 }
 0x1f5   : > { %v1007_v58 = vadd.f32 %v1006_v57, %v3233_v30  ;;  %v1008_v59 = vpop.f32.mrb[25].mxu1 }
 0x1f6   : > { %v1009_v60 = vadd.f32 %v1008_v59, %v3236_v31  ;;  %v1010_v61 = vpop.f32.mrb[26].mxu1  ;;  %1280 = vmatprep.mubr.bf16.mxu0 %v1068_v56 }
 0x1f7   : > { %v1011_v62 = vadd.f32 %v1010_v61, %v3233_v30  ;;  %v1012_v63 = vpop.f32.mrb[27].mxu1  ;;  %1281 = vmatmul.mubr.bf16.gmra.mrb[52].mxu0 %v1067_v55  ;;  %v1049_v1 = vmax.f32 %v1007_v58, 0.0 }
 0x1f8   : > { %v1013_v0 = vadd.f32 %v1012_v63, %v3236_v31  ;;  %v1050_v4 = vmax.f32 %v1009_v60, 0.0 }
 0x1f9   : > { %v1051_v2 = vmax.f32 %v1011_v62, 0.0 }
 0x1fa   : > { %v1052_v5 = vmax.f32 %v1013_v0, 0.0 }
 0x1fb   : > { %v1069_v6 = vpack.c.bf16 %v1051_v2, %v1049_v1 }
 0x1fc   : > { %v1070_v7 = vpack.c.bf16 %v1052_v5, %v1050_v4  ;;  %v1016_v8 = vpop.f32.mrb[28].mxu1 }
 0x1fd   : > { %v1017_v9 = vadd.f32 %v1016_v8, %v3233_v30  ;;  %v1018_v10 = vpop.f32.mrb[29].mxu1 }
 0x1fe   : > { %v1019_v11 = vadd.f32 %v1018_v10, %v3236_v31  ;;  %v1020_v19 = vpop.f32.mrb[30].mxu1  ;;  %1288 = vmatprep.mubr.bf16.mxu0 %v1070_v7 }
 0x1ff   : > { %v1021_v20 = vadd.f32 %v1020_v19, %v3233_v30  ;;  %v1022_v12 = vpop.f32.mrb[31].mxu1  ;;  %1289 = vmatmul.mubr.bf16.gmra.mrb[56].mxu0 %v1069_v6  ;;  %v1053_v14 = vmax.f32 %v1017_v9, 0.0  ;;  %v2758_v30 = vld [vmem:[%s3977_s7 + $0x70] ss:$8 sps:$4 sm:$0xff]  }
 0x200   : > { %v1023_v13 = vadd.f32 %v1022_v12, %v3236_v31  ;;  %v1054_v17 = vmax.f32 %v1019_v11, 0.0  ;;  %1452 = vmatpush1.bf16.msra.mxu1 %v2758_v30  ;;  %v3279_v31 = vld [vmem:[%s3976_s6] ss:$0 sm:$0xff] }
 0x201   : > { %v1055_v15 = vmax.f32 %v1021_v20, 0.0 }
 0x202   : > { %v1056_v21 = vmax.f32 %v1023_v13, 0.0 }
 0x203   : > { %v1071_v22 = vpack.c.bf16 %v1055_v15, %v1053_v14 }
 0x204   : > { %v1072_v23 = vpack.c.bf16 %v1056_v21, %v1054_v17 }
 0x206   : > { %1296 = vmatprep.mubr.bf16.mxu0 %v1072_v23 }
 0x207   : > { %1297 = vmatmul.mubr.bf16.gmra.mrb[60].mxu0 %v1071_v22 }
 0x2a2   : > { %v2449_v25 = vpop.f32.mrb[32].mxu0 }
 0x2a3   : > { %v2450_v26 = vpop.f32.mrb[33].mxu0 }
 0x2a4   : > { %v2451_v27 = vadd.f32 %v2450_v26, %v2449_v25  ;;  %v2452_v28 = vpop.f32.mrb[34].mxu0 }
 0x2a5   : > { %v2453_v29 = vpop.f32.mrb[35].mxu0 }
 0x2a6   : > { %v1243_v32 = vadd.f32 %v2451_v27, %v3279_v31  ;;  %v2454_v33 = vadd.f32 %v2453_v29, %v2452_v28 }
 0x2a8   : > { %v1246_v34 = vadd.f32 %v2454_v33, %v3279_v31  ;;  %v1305_v35 = vmax.f32 %v1243_v32, 0.0 }
 0x2aa   : > { %v1306_v36 = vmax.f32 %v1246_v34, 0.0  ;;  %v2455_v37 = vpop.f32.mrb[36].mxu0 }
 0x2ab   : > { %v2456_v38 = vpop.f32.mrb[37].mxu0 }
 0x2ac   : > { %v1321_v39 = vpack.c.bf16 %v1306_v36, %v1305_v35  ;;  %v2457_v40 = vadd.f32 %v2456_v38, %v2455_v37  ;;  %v2458_v41 = vpop.f32.mrb[38].mxu0 }
 0x2ad   : > { %v2459_v42 = vpop.f32.mrb[39].mxu0 }
 0x2ae   : > { %v1251_v43 = vadd.f32 %v2457_v40, %v3279_v31  ;;  %v2460_v44 = vadd.f32 %v2459_v42, %v2458_v41  ;;  %1470 = vmatmul.mubr.bf16.vlgmr.msra.gmra.mrb[32].mxu1 %v1321_v39 }
 0x2af   : > { %1479 = vmatprep.mubr.bf16.mxu1 %v2865_v3 }
 0x2b0   : > { %v1254_v45 = vadd.f32 %v2460_v44, %v3279_v31  ;;  %v1307_v46 = vmax.f32 %v1251_v43, 0.0 }
 0x2b2   : > { %v1308_v47 = vmax.f32 %v1254_v45, 0.0  ;;  %v2461_v48 = vpop.f32.mrb[40].mxu0 }
 0x2b3   : > { %v2462_v49 = vpop.f32.mrb[41].mxu0 }
 0x2b4   : > { %v2463_v50 = vadd.f32 %v2462_v49, %v2461_v48  ;;  %v2464_v51 = vpop.f32.mrb[42].mxu0  ;;  %v1322_v52 = vpack.c.bf16 %v1308_v47, %v1307_v46 }
 0x2b5   : > { %v2465_v53 = vpop.f32.mrb[43].mxu0 }
 0x2b6   : > { %v1259_v54 = vadd.f32 %v2463_v50, %v3279_v31  ;;  %v2466_v55 = vadd.f32 %v2465_v53, %v2464_v51  ;;  %1480 = vmatmul.mubr.bf16.gmra.mrb[36].mxu1 %v1322_v52 }
 0x2b7   : > { %1489 = vmatprep.mubr.bf16.mxu1 %v2865_v3 }
 0x2b8   : > { %v1262_v56 = vadd.f32 %v2466_v55, %v3279_v31  ;;  %v1309_v57 = vmax.f32 %v1259_v54, 0.0  ;;  %v1710_v55 = vld [vmem:[%s3979_s9 + $0x80] sm:$0xff] }
 0x2ba   : > { %v1310_v58 = vmax.f32 %v1262_v56, 0.0  ;;  %v2467_v59 = vpop.f32.mrb[44].mxu0  ;;  %v1711_v56 = vld [vmem:[%s3979_s9 + $0x88] sm:$0xff] }
 0x2bb   : > { %v2468_v60 = vpop.f32.mrb[45].mxu0 }
 0x2bc   : > { %v2469_v61 = vadd.f32 %v2468_v60, %v2467_v59  ;;  %v2470_v62 = vpop.f32.mrb[46].mxu0  ;;  %v1323_v63 = vpack.c.bf16 %v1310_v58, %v1309_v57  ;;  %v1694_v57 = vld [vmem:[%s3979_s9] sm:$0xff]  ;;  %v2577_v58 = vpack.c.bf16 %v1711_v56, %v1710_v55  ;;  %v1713_v59 = vld [vmem:[%s3979_s9 + $0x98] sm:$0xff] }
 0x2bd   : > { %v2471_v0 = vpop.f32.mrb[47].mxu0 }
 0x2be   : > { %v1267_v1 = vadd.f32 %v2469_v61, %v3279_v31  ;;  %v2472_v2 = vadd.f32 %v2471_v0, %v2470_v62  ;;  %1490 = vmatmul.mubr.bf16.gmra.mrb[40].mxu1 %v1323_v63  ;;  %v1696_v62 = vld [vmem:[%s3979_s9 + $0x10] sm:$0xff]  ;;  %v1697_v63 = vld [vmem:[%s3979_s9 + $0x18] sm:$0xff]  ;;  %v1714_v0 = vld [vmem:[%s3979_s9 + $0xa0] sm:$0xff]  ;;  %2578 = vmatprep.subr.bf16.mxu0 %v2577_v58 }
 0x2bf   : > { %1499 = vmatprep.mubr.bf16.mxu1 %v2865_v3 }
 0x2c0   : > { %v1270_v4 = vadd.f32 %v2472_v2, %v3279_v31  ;;  %v1311_v5 = vmax.f32 %v1267_v1, 0.0  ;;  %v1715_v1 = vld [vmem:[%s3979_s9 + $0xa8] sm:$0xff]  ;;  %v2583_v2 = vpack.c.bf16 %v1697_v63, %v1696_v62 }
 0x2c2   : > { %v1312_v6 = vmax.f32 %v1270_v4, 0.0  ;;  %v2473_v7 = vpop.f32.mrb[48].mxu0  ;;  %v2585_v4 = vpack.c.bf16 %v1715_v1, %v1714_v0  ;;  %v1706_v0 = vld [vmem:[%s3979_s9 + $0x60] sm:$0xff]  ;;  %v1707_v1 = vld [vmem:[%s3979_s9 + $0x68] sm:$0xff] }
 0x2c3   : > { %v2474_v8 = vpop.f32.mrb[49].mxu0 }
 0x2c4   : > { %v2475_v9 = vadd.f32 %v2474_v8, %v2473_v7  ;;  %v2476_v10 = vpop.f32.mrb[50].mxu0  ;;  %v1324_v11 = vpack.c.bf16 %v1312_v6, %v1311_v5  ;;  %v1698_v5 = vld [vmem:[%s3979_s9 + $0x20] sm:$0xff]  ;;  %v1699_v6 = vld [vmem:[%s3979_s9 + $0x28] sm:$0xff]  ;;  %v1716_v7 = vld [vmem:[%s3979_s9 + $0xb0] sm:$0xff] }
 0x2c5   : > { %v2477_v19 = vpop.f32.mrb[51].mxu0  ;;  %v1717_v8 = vld [vmem:[%s3979_s9 + $0xb8] sm:$0xff] }
 0x2c6   : > { %v1275_v20 = vadd.f32 %v2475_v9, %v3279_v31  ;;  %v2478_v12 = vadd.f32 %v2477_v19, %v2476_v10  ;;  %1500 = vmatmul.mubr.bf16.gmra.mrb[44].mxu1 %v1324_v11  ;;  %v2587_v9 = vpack.c.bf16 %v1699_v6, %v1698_v5  ;;  %v2589_v10 = vpack.c.bf16 %v1717_v8, %v1716_v7  ;;  %v1700_v11 = vld [vmem:[%s3979_s9 + $0x30] sm:$0xff]  ;;  %v1701_v19 = vld [vmem:[%s3979_s9 + $0x38] sm:$0xff] }
 0x2c7   : > { %1509 = vmatprep.mubr.bf16.mxu1 %v2865_v3  ;;  %v2603_v5 = vpack.c.bf16 %v1707_v1, %v1706_v0 }
 0x2c8   : > { %v1278_v13 = vadd.f32 %v2478_v12, %v3279_v31  ;;  %v1313_v14 = vmax.f32 %v1275_v20, 0.0  ;;  %v1718_v20 = vld [vmem:[%s3979_s9 + $0xc0] sm:$0xff]  ;;  %v1719_v12 = vld [vmem:[%s3979_s9 + $0xc8] sm:$0xff] }
 0x2ca   : > { %v1314_v15 = vmax.f32 %v1278_v13, 0.0  ;;  %v2479_v17 = vpop.f32.mrb[52].mxu0  ;;  %v2591_v13 = vpack.c.bf16 %v1701_v19, %v1700_v11  ;;  %v1725_v11 = vld [vmem:[%s3979_s9 + $0xf8] sm:$0xff] }
 0x2cb   : > { %v2480_v21 = vpop.f32.mrb[53].mxu0 }
 0x2cc   : > { %v2481_v22 = vadd.f32 %v2480_v21, %v2479_v17  ;;  %v2482_v23 = vpop.f32.mrb[54].mxu0  ;;  %v1325_v24 = vpack.c.bf16 %v1314_v15, %v1313_v14  ;;  %v2593_v14 = vpack.c.bf16 %v1719_v12, %v1718_v20  ;;  %v1702_v15 = vld [vmem:[%s3979_s9 + $0x40] sm:$0xff]  ;;  %v1703_v17 = vld [vmem:[%s3979_s9 + $0x48] sm:$0xff]  ;;  %v1720_v21 = vld [vmem:[%s3979_s9 + $0xd0] sm:$0xff] }
 0x2cd   : > { %v2483_v30 = vpop.f32.mrb[55].mxu0  ;;  %v1708_v12 = vld [vmem:[%s3979_s9 + $0x70] sm:$0xff] }
 0x2ce   : > { %v1283_v25 = vadd.f32 %v2481_v22, %v3279_v31  ;;  %v2484_v26 = vadd.f32 %v2483_v30, %v2482_v23  ;;  %1510 = vmatmul.mubr.bf16.gmra.mrb[48].mxu1 %v1325_v24  ;;  %v1721_v22 = vld [vmem:[%s3979_s9 + $0xd8] sm:$0xff]  ;;  %v2595_v23 = vpack.c.bf16 %v1703_v17, %v1702_v15  ;;  %v1704_v30 = vld [vmem:[%s3979_s9 + $0x50] sm:$0xff] }
 0x2cf   : > { %1519 = vmatprep.mubr.bf16.mxu1 %v2865_v3  ;;  %v2597_v24 = vpack.c.bf16 %v1721_v22, %v1720_v21 }
 0x2d0   : > { %v1286_v27 = vadd.f32 %v2484_v26, %v3279_v31  ;;  %v1315_v28 = vmax.f32 %v1283_v25, 0.0  ;;  %v1705_v25 = vld [vmem:[%s3979_s9 + $0x58] sm:$0xff]  ;;  %v1722_v26 = vld [vmem:[%s3979_s9 + $0xe0] sm:$0xff] }
 0x2d2   : > { %v1316_v29 = vmax.f32 %v1286_v27, 0.0  ;;  %v2485_v32 = vpop.f32.mrb[56].mxu0  ;;  %v1723_v27 = vld [vmem:[%s3979_s9 + $0xe8] sm:$0xff] }
 0x2d3   : > { %v2486_v33 = vpop.f32.mrb[57].mxu0 }
 0x2d4   : > { %v2487_v34 = vadd.f32 %v2486_v33, %v2485_v32  ;;  %v2488_v35 = vpop.f32.mrb[58].mxu0  ;;  %v1326_v36 = vpack.c.bf16 %v1316_v29, %v1315_v28  ;;  %v2599_v28 = vpack.c.bf16 %v1705_v25, %v1704_v30  ;;  %v2601_v29 = vpack.c.bf16 %v1723_v27, %v1722_v26  ;;  %v1345_v32 = vld [vmem:[%s3978_s8] sm:$0x3] }
 0x2d5   : > { %v2489_v37 = vpop.f32.mrb[59].mxu0  ;;  %v3386_v33 = vrot.slane %v1345_v32, %v3135_v16 }
 0x2d6   : > { %v1291_v38 = vadd.f32 %v2487_v34, %v3279_v31  ;;  %v2490_v39 = vadd.f32 %v2489_v37, %v2488_v35  ;;  %1520 = vmatmul.mubr.bf16.gmra.mrb[52].mxu1 %v1326_v36  ;;  %v3389_v34 = vrot.slane %v1345_v32, %v3140_v18 }
 0x2d7   : > { %1529 = vmatprep.mubr.bf16.mxu1 %v2865_v3 }
 0x2d8   : > { %v1294_v40 = vadd.f32 %v2490_v39, %v3279_v31  ;;  %v1317_v41 = vmax.f32 %v1291_v38, 0.0 }
 0x2da   : > { %v1318_v42 = vmax.f32 %v1294_v40, 0.0  ;;  %v2491_v43 = vpop.f32.mrb[60].mxu0 }
 0x2db   : > { %v2492_v44 = vpop.f32.mrb[61].mxu0 }
 0x2dc   : > { %v2493_v45 = vadd.f32 %v2492_v44, %v2491_v43  ;;  %v2494_v46 = vpop.f32.mrb[62].mxu0  ;;  %v1327_v47 = vpack.c.bf16 %v1318_v42, %v1317_v41 }
 0x2dd   : > { %v2495_v48 = vpop.f32.mrb[63].mxu0 }
 0x2de   : > { %v1299_v49 = vadd.f32 %v2493_v45, %v3279_v31  ;;  %v2496_v50 = vadd.f32 %v2495_v48, %v2494_v46  ;;  %1530 = vmatmul.mubr.bf16.gmra.mrb[56].mxu1 %v1327_v47 }
 0x2df   : > { %1539 = vmatprep.mubr.bf16.mxu1 %v2865_v3  ;;  %v1695_v3 = vld [vmem:[%s3979_s9 + $0x8] sm:$0xff] }
 0x2e0   : > { %v1302_v51 = vadd.f32 %v2496_v50, %v3279_v31  ;;  %v1319_v52 = vmax.f32 %v1299_v49, 0.0  ;;  %v1712_v31 = vld [vmem:[%s3979_s9 + $0x90] sm:$0xff]  ;;  %v2579_v60 = vpack.c.bf16 %v1695_v3, %v1694_v57 }
 0x2e1   : > { %v2581_v61 = vpack.c.bf16 %v1713_v59, %v1712_v31 }
 0x2e2   : > { %v1320_v53 = vmax.f32 %v1302_v51, 0.0  ;;  %2580 = vmatpush3.bf16.msra.mxu0 %v2579_v60 }
 0x2e3   : > { %2582 = vmatprep.subr.bf16.mxu0 %v2581_v61 }
 0x2e4   : > { %v1328_v54 = vpack.c.bf16 %v1320_v53, %v1319_v52 }
 0x2e6   : > { %1540 = vmatmul.mubr.bf16.gmra.mrb[60].mxu1 %v1328_v54  ;;  %2584 = vmatpush3.bf16.msra.mxu0 %v2583_v2 }
 0x2e7   : > { %2586 = vmatprep.subr.bf16.mxu0 %v2585_v4 }
 0x2ea   : > { %2588 = vmatpush3.bf16.msra.mxu0 %v2587_v9 }
 0x2eb   : > { %2590 = vmatprep.subr.bf16.mxu0 %v2589_v10  ;;  %v1724_v10 = vld [vmem:[%s3979_s9 + $0xf0] sm:$0xff] }
 0x2ec   : > { %v2605_v20 = vpack.c.bf16 %v1725_v11, %v1724_v10  ;;  %v1991_v11 = vld [vmem:[%s3980_s10 + $0x8] sm:$0xff] }
 0x2ee   : > { %2592 = vmatpush3.bf16.msra.mxu0 %v2591_v13  ;;  %v1709_v13 = vld [vmem:[%s3979_s9 + $0x78] sm:$0xff] }
 0x2ef   : > { %2594 = vmatprep.subr.bf16.mxu0 %v2593_v14  ;;  %v2607_v15 = vpack.c.bf16 %v1709_v13, %v1708_v12  ;;  %v1995_v12 = vld [vmem:[%s3980_s10 + $0x28] sm:$0xff]  ;;  %v1997_v13 = vld [vmem:[%s3980_s10 + $0x38] sm:$0xff] }
 0x2f2   : > { %2596 = vmatpush3.bf16.msra.mxu0 %v2595_v23 }
 0x2f3   : > { %2598 = vmatprep.subr.bf16.mxu0 %v2597_v24 }
 0x2f6   : > { %2600 = vmatpush3.bf16.msra.mxu0 %v2599_v28 }
 0x2f7   : > { %2602 = vmatprep.subr.bf16.mxu0 %v2601_v29 }
 0x2fa   : > { %2604 = vmatpush3.bf16.msra.mxu0 %v2603_v5 }
 0x2fb   : > { %2606 = vmatprep.subr.bf16.mxu0 %v2605_v20  ;;  %v1992_v20 = vld [vmem:[%s3980_s10 + $0x10] sm:$0xff] }
 0x2fe   : > { %2608 = vmatpush3.bf16.msra.mxu0 %v2607_v15  ;;  %v2613_v15 = vpack.c.bf16 %v1997_v13, %v1995_v12 }
 0x381   : > { %v1471_v35 = vpop.f32.mrb[32].mxu1 }
 0x382   : > { %v3392_v36 = vadd.f32 %v1471_v35, %v3386_v33  ;;  %v1473_v37 = vpop.f32.mrb[33].mxu1 }
 0x383   : > { %v3395_v38 = vadd.f32 %v1473_v37, %v3389_v34  ;;  %v1475_v39 = vpop.f32.mrb[34].mxu1 }
 0x384   : > { %v1477_v40 = vpop.f32.mrb[35].mxu1  ;;  %v3398_v41 = vadd.f32 %v1475_v39, %v3386_v33 }
 0x385   : > { %v3401_v42 = vadd.f32 %v1477_v40, %v3389_v34  ;;  %v1550_v16 = vmax.f32 %v3392_v36, %v3395_v38 }
 0x387   : > { %1551 = vmax.xlane.f32.xlu0 %v1550_v16  ;;  %v1553_v43 = vmax.f32 %v3398_v41, %v3401_v42 }
 0x389   : > { %v1481_v18 = vpop.f32.mrb[36].mxu1 }
 0x38a   : > { %v3408_v44 = vadd.f32 %v1481_v18, %v3386_v33  ;;  %v1483_v45 = vpop.f32.mrb[37].mxu1 }
 0x38b   : > { %v3411_v46 = vadd.f32 %v1483_v45, %v3389_v34  ;;  %v1485_v47 = vpop.f32.mrb[38].mxu1  ;;  %1554 = vmax.xlane.f32.xlu0 %v1553_v43 }
 0x38c   : > { %v1487_v48 = vpop.f32.mrb[39].mxu1  ;;  %v3414_v49 = vadd.f32 %v1485_v47, %v3386_v33 }
 0x38d   : > { %v3417_v50 = vadd.f32 %v1487_v48, %v3389_v34  ;;  %v1556_v51 = vmax.f32 %v3408_v44, %v3411_v46 }
 0x38f   : > { %1557 = vmax.xlane.f32.xlu1 %v1556_v51  ;;  %v1559_v53 = vmax.f32 %v3414_v49, %v3417_v50 }
 0x391   : > { %v1491_v52 = vpop.f32.mrb[40].mxu1 }
 0x392   : > { %v3424_v54 = vadd.f32 %v1491_v52, %v3386_v33  ;;  %v1493_v55 = vpop.f32.mrb[41].mxu1 }
 0x393   : > { %v3427_v56 = vadd.f32 %v1493_v55, %v3389_v34  ;;  %v1495_v57 = vpop.f32.mrb[42].mxu1  ;;  %1560 = vmax.xlane.f32.xlu1 %v1559_v53 }
 0x394   : > { %v3430_v58 = vadd.f32 %v1495_v57, %v3386_v33  ;;  %v1497_v3 = vpop.f32.mrb[43].mxu1 }
 0x395   : > { %v3433_v31 = vadd.f32 %v1497_v3, %v3389_v34  ;;  %v1562_v59 = vmax.f32 %v3424_v54, %v3427_v56 }
 0x397   : > { %1563 = vmax.xlane.f32.xlu0 %v1562_v59  ;;  %v1565_v60 = vmax.f32 %v3430_v58, %v3433_v31 }
 0x399   : > { %v1501_v61 = vpop.f32.mrb[44].mxu1  ;;  %1566 = vmax.xlane.f32.xlu1 %v1565_v60 }
 0x39a   : > { %v3440_v62 = vadd.f32 %v1501_v61, %v3386_v33  ;;  %v1503_v63 = vpop.f32.mrb[45].mxu1 }
 0x39b   : > { %v3449_v2 = vadd.f32 %v1503_v63, %v3389_v34  ;;  %v1505_v4 = vpop.f32.mrb[46].mxu1 }
 0x39c   : > { %v3452_v6 = vadd.f32 %v1505_v4, %v3386_v33  ;;  %v1507_v7 = vpop.f32.mrb[47].mxu1 }
 0x39d   : > { %v3455_v8 = vadd.f32 %v1507_v7, %v3389_v34  ;;  %v1568_v9 = vmax.f32 %v3440_v62, %v3449_v2 }
 0x39f   : > { %1569 = vmax.xlane.f32.xlu0 %v1568_v9  ;;  %v1571_v19 = vmax.f32 %v3452_v6, %v3455_v8 }
 0x3a1   : > { %v1511_v14 = vpop.f32.mrb[48].mxu1  ;;  %1572 = vmax.xlane.f32.xlu1 %v1571_v19 }
 0x3a2   : > { %v3474_v17 = vadd.f32 %v1511_v14, %v3386_v33  ;;  %v1513_v21 = vpop.f32.mrb[49].mxu1 }
 0x3a3   : > { %v3477_v22 = vadd.f32 %v1513_v21, %v3389_v34  ;;  %v1515_v23 = vpop.f32.mrb[50].mxu1  ;;  %v1994_v21 = vld [vmem:[%s3980_s10 + $0x20] sm:$0xff] }
 0x3a4   : > { %v3480_v24 = vadd.f32 %v1515_v23, %v3386_v33  ;;  %v1517_v30 = vpop.f32.mrb[51].mxu1  ;;  %v1996_v23 = vld [vmem:[%s3980_s10 + $0x30] sm:$0xff] }
 0x3a5   : > { %v3483_v25 = vadd.f32 %v1517_v30, %v3389_v34  ;;  %v1574_v26 = vmax.f32 %v3474_v17, %v3477_v22  ;;  %v1999_v30 = vld [vmem:[%s3980_s10 + $0x48] sm:$0xff] }
 0x3a7   : > { %1575 = vmax.xlane.f32.xlu0 %v1574_v26  ;;  %v1577_v27 = vmax.f32 %v3480_v24, %v3483_v25  ;;  %v2001_v26 = vld [vmem:[%s3980_s10 + $0x58] sm:$0xff] }
 0x3a9   : > { %v1521_v28 = vpop.f32.mrb[52].mxu1  ;;  %1578 = vmax.xlane.f32.xlu1 %v1577_v27  ;;  %v2615_v27 = vpack.c.bf16 %v1996_v23, %v1994_v21 }
 0x3aa   : > { %v3490_v29 = vadd.f32 %v1521_v28, %v3386_v33  ;;  %v1523_v32 = vpop.f32.mrb[53].mxu1  ;;  %v3570_v28 = vpack.c.bf16 %v2001_v26, %v1999_v30 }
 0x3ab   : > { %v3493_v35 = vadd.f32 %v1523_v32, %v3389_v34  ;;  %v1525_v37 = vpop.f32.mrb[54].mxu1  ;;  %v1998_v32 = vld [vmem:[%s3980_s10 + $0x40] sm:$0xff] }
 0x3ac   : > { %v3496_v39 = vadd.f32 %v1525_v37, %v3386_v33  ;;  %v1527_v40 = vpop.f32.mrb[55].mxu1  ;;  %v2000_v37 = vld [vmem:[%s3980_s10 + $0x50] sm:$0xff] }
 0x3ad   : > { %v3499_v16 = vadd.f32 %v1527_v40, %v3389_v34  ;;  %v1580_v18 = vmax.f32 %v3490_v29, %v3493_v35  ;;  %v2003_v40 = vld [vmem:[%s3980_s10 + $0x68] sm:$0xff] }
 0x3af   : > { %1581 = vmax.xlane.f32.xlu0 %v1580_v18  ;;  %v1583_v43 = vmax.f32 %v3496_v39, %v3499_v16  ;;  %v2005_v18 = vld [vmem:[%s3980_s10 + $0x78] sm:$0xff] }
 0x3b1   : > { %v1531_v45 = vpop.f32.mrb[56].mxu1  ;;  %1584 = vmax.xlane.f32.xlu1 %v1583_v43  ;;  %v3585_v43 = vpack.c.bf16 %v2000_v37, %v1998_v32 }
 0x3b2   : > { %v3506_v47 = vadd.f32 %v1531_v45, %v3386_v33  ;;  %v1533_v48 = vpop.f32.mrb[57].mxu1  ;;  %v3587_v45 = vpack.c.bf16 %v2005_v18, %v2003_v40 }
 0x3b3   : > { %v3509_v51 = vadd.f32 %v1533_v48, %v3389_v34  ;;  %v1535_v52 = vpop.f32.mrb[58].mxu1 }
 0x3b4   : > { %v3512_v53 = vadd.f32 %v1535_v52, %v3386_v33  ;;  %v1537_v55 = vpop.f32.mrb[59].mxu1 }
 0x3b5   : > { %v3515_v57 = vadd.f32 %v1537_v55, %v3389_v34  ;;  %v1586_v3 = vmax.f32 %v3506_v47, %v3509_v51 }
 0x3b7   : > { %1587 = vmax.xlane.f32.xlu0 %v1586_v3  ;;  %v1589_v59 = vmax.f32 %v3512_v53, %v3515_v57 }
 0x3b9   : > { %v1541_v60 = vpop.f32.mrb[60].mxu1  ;;  %1590 = vmax.xlane.f32.xlu1 %v1589_v59 }
 0x3ba   : > { %v3522_v61 = vadd.f32 %v1541_v60, %v3386_v33  ;;  %v1543_v63 = vpop.f32.mrb[61].mxu1 }
 0x3bb   : > { %v3525_v0 = vadd.f32 %v1543_v63, %v3389_v34  ;;  %v1545_v1 = vpop.f32.mrb[62].mxu1 }
 0x3bc   : > { %v3528_v4 = vadd.f32 %v1545_v1, %v3386_v33  ;;  %v1547_v5 = vpop.f32.mrb[63].mxu1  ;;  %v1993_v33 = vld [vmem:[%s3980_s10 + $0x18] sm:$0xff] }
 0x3bd   : > { %v3531_v7 = vadd.f32 %v1547_v5, %v3389_v34  ;;  %v1592_v9 = vmax.f32 %v3522_v61, %v3525_v0  ;;  %v1990_v34 = vld [vmem:[%s3980_s10] sm:$0xff]  ;;  %v2609_v19 = vpack.c.bf16 %v1993_v33, %v1991_v11 }
 0x3be   : > { %v3555_v14 = vpack.c.bf16 %v1992_v20, %v1990_v34 }
 0x3bf   : > { %1593 = vmax.xlane.f32.xlu0 %v1592_v9  ;;  %v1595_v10 = vmax.f32 %v3528_v4, %v3531_v7  ;;  %2641 = vmatprep.subr.bf16.mxu1 %v2609_v19 }
 0x3c0   : > { %2610 = vmatprep.subr.bf16.mxu0 %v2609_v19  ;;  %2649 = vmatpush1.bf16.msra.mxu1 %v3555_v14 }
 0x3c1   : > { %1596 = vmax.xlane.f32.xlu1 %v1595_v10  ;;  %2642 = vmatprep.subr.bf16.mxu1 %v2613_v15 }
 0x3c4   : > { %2650 = vmatpush1.bf16.msra.mxu1 %v2615_v27 }
 0x3c5   : > { %2643 = vmatprep.subr.bf16.mxu1 %v3570_v28 }
 0x3c8   : > { %2651 = vmatpush1.bf16.msra.mxu1 %v3585_v43 }
 0x3c9   : > { %2644 = vmatprep.subr.bf16.mxu1 %v3587_v45 }
 0x414   : > { %v1552_v48 = vpop.xlane.xlu0 %1551 }
 0x415   : > { %v1598_v52 = vsub.f32 %v3392_v36, %v1552_v48  ;;  %v1599_v55 = vsub.f32 %v3395_v38, %v1552_v48 }
 0x417   : > { %v1630_v3 = vmul.f32 1.442695, %v1598_v52  ;;  %v1632_v59 = vmul.f32 1.442695, %v1599_v55 }
 0x418   : > { %v1555_v60 = vpop.xlane.xlu0 %1554 }
 0x419   : > { %2761 = vpow2.f32 %v1630_v3  ;;  %v1600_v63 = vsub.f32 %v3398_v41, %v1555_v60  ;;  %v1601_v1 = vsub.f32 %v3401_v42, %v1555_v60 }
 0x41a   : > { %2763 = vpow2.f32 %v1632_v59 }
 0x41b   : > { %v1634_v5 = vmul.f32 1.442695, %v1600_v63  ;;  %v1636_v9 = vmul.f32 1.442695, %v1601_v1 }
 0x41c   : > { %v1558_v10 = vpop.xlane.xlu1 %1557 }
 0x41d   : > { %2765 = vpow2.f32 %v1634_v5  ;;  %v1602_v11 = vsub.f32 %v3408_v44, %v1558_v10  ;;  %v1603_v33 = vsub.f32 %v3411_v46, %v1558_v10 }
 0x41e   : > { %2767 = vpow2.f32 %v1636_v9 }
 0x41f   : > { %v1638_v36 = vmul.f32 1.442695, %v1602_v11  ;;  %v1640_v38 = vmul.f32 1.442695, %v1603_v33 }
 0x420   : > { %v1561_v34 = vpop.xlane.xlu1 %1560 }
 0x421   : > { %2769 = vpow2.f32 %v1638_v36  ;;  %v1604_v19 = vsub.f32 %v3414_v49, %v1561_v34  ;;  %v1605_v41 = vsub.f32 %v3417_v50, %v1561_v34 }
 0x422   : > { %2771 = vpow2.f32 %v1640_v38 }
 0x423   : > { %v3599_v42 = vpop.eup %2761  ;;  %v1642_v20 = vmul.f32 1.442695, %v1604_v19  ;;  %v1644_v12 = vmul.f32 1.442695, %v1605_v41 }
 0x424   : > { %v3601_v13 = vpop.eup %2763  ;;  %v1564_v21 = vpop.xlane.xlu0 %1563 }
 0x425   : > { %2773 = vpow2.f32 %v1642_v20  ;;  %1790 = vmatprep.mubr.f32.mxu0 %v3601_v13  ;;  %v1606_v44 = vsub.f32 %v3424_v54, %v1564_v21  ;;  %v1607_v46 = vsub.f32 %v3427_v56, %v1564_v21 }
 0x426   : > { %2775 = vpow2.f32 %v1644_v12  ;;  %1791 = vmatmul.mubr.f32.vlgmr.msra.gmra.mrb[64].mxu0 %v3599_v42  ;;  %v1567_v49 = vpop.xlane.xlu1 %1566 }
 0x427   : > { %v3607_v50 = vpop.eup %2765  ;;  %v1646_v23 = vmul.f32 1.442695, %v1606_v44  ;;  %v1648_v30 = vmul.f32 1.442695, %v1607_v46  ;;  %v1608_v26 = vsub.f32 %v3430_v58, %v1567_v49  ;;  %v1609_v32 = vsub.f32 %v3433_v31, %v1567_v49  ;;  %2612 = vmatpush1.bf16.msra.mxu0 %v3555_v14 }
 0x428   : > { %v3612_v37 = vpop.eup %2767  ;;  %2614 = vmatprep.subr.bf16.mxu0 %v2613_v15 }
 0x429   : > { %2777 = vpow2.f32 %v1646_v23  ;;  %v1652_v54 = vmul.f32 1.442695, %v1609_v32  ;;  %1795 = vmatprep.mubr.f32.mxu0 %v3612_v37  ;;  %v1650_v56 = vmul.f32 1.442695, %v1608_v26 }
 0x42a   : > { %2779 = vpow2.f32 %v1648_v30  ;;  %1796 = vmatmul.mubr.f32.gmra.mrb[66].mxu0 %v3607_v50 }
 0x42b   : > { %v3616_v40 = vpop.eup %2769  ;;  %2616 = vmatpush1.bf16.msra.mxu0 %v2615_v27  ;;  %2781 = vpow2.f32 %v1652_v54 }
 0x42c   : > { %v3618_v18 = vpop.eup %2771  ;;  %v1570_v58 = vpop.xlane.xlu0 %1569  ;;  %2618 = vmatprep.subr.bf16.mxu0 %v3570_v28  ;;  %2783 = vpow2.f32 %v1650_v56 }
 0x42d   : > { %1800 = vmatprep.mubr.f32.mxu0 %v3618_v18  ;;  %v1610_v31 = vsub.f32 %v3440_v62, %v1570_v58  ;;  %v1611_v14 = vsub.f32 %v3449_v2, %v1570_v58 }
 0x42e   : > { %1801 = vmatmul.mubr.f32.gmra.mrb[68].mxu0 %v3616_v40  ;;  %v1573_v15 = vpop.xlane.xlu1 %1572 }
 0x42f   : > { %v3625_v48 = vpop.eup %2773  ;;  %v1654_v52 = vmul.f32 1.442695, %v1610_v31  ;;  %v1656_v27 = vmul.f32 1.442695, %v1611_v14  ;;  %v1612_v55 = vsub.f32 %v3452_v6, %v1573_v15  ;;  %v1613_v3 = vsub.f32 %v3455_v8, %v1573_v15  ;;  %2620 = vmatpush1.bf16.msra.mxu0 %v3585_v43 }
 0x430   : > { %v3630_v28 = vpop.eup %2775  ;;  %2622 = vmatprep.subr.bf16.mxu0 %v3587_v45 }
 0x431   : > { %2785 = vpow2.f32 %v1654_v52  ;;  %v1660_v62 = vmul.f32 1.442695, %v1613_v3  ;;  %1805 = vmatprep.mubr.f32.mxu0 %v3630_v28  ;;  %v1658_v2 = vmul.f32 1.442695, %v1612_v55 }
 0x432   : > { %2787 = vpow2.f32 %v1656_v27  ;;  %1806 = vmatmul.mubr.f32.gmra.mrb[70].mxu0 %v3625_v48 }
 0x433   : > { %v3635_v59 = vpop.eup %2777  ;;  %2789 = vpow2.f32 %v1660_v62 }
 0x434   : > { %v3637_v60 = vpop.eup %2779  ;;  %v1576_v6 = vpop.xlane.xlu0 %1575  ;;  %2791 = vpow2.f32 %v1658_v2 }
 0x435   : > { %1810 = vmatprep.mubr.f32.mxu0 %v3637_v60  ;;  %v1614_v8 = vsub.f32 %v3474_v17, %v1576_v6  ;;  %v1615_v43 = vsub.f32 %v3477_v22, %v1576_v6  ;;  %v3642_v45 = vpop.eup %2781 }
 0x436   : > { %1811 = vmatmul.mubr.f32.gmra.mrb[72].mxu0 %v3635_v59  ;;  %v1579_v63 = vpop.xlane.xlu1 %1578  ;;  %v3648_v11 = vpop.eup %2783 }
 0x437   : > { %v1662_v1 = vmul.f32 1.442695, %v1614_v8  ;;  %v1664_v5 = vmul.f32 1.442695, %v1615_v43  ;;  %v1616_v9 = vsub.f32 %v3480_v24, %v1579_v63  ;;  %v1617_v10 = vsub.f32 %v3483_v25, %v1579_v63  ;;  %1815 = vmatprep.mubr.f32.mxu0 %v3642_v45 }
 0x439   : > { %2793 = vpow2.f32 %v1662_v1  ;;  %v1668_v17 = vmul.f32 1.442695, %v1617_v10  ;;  %v1666_v22 = vmul.f32 1.442695, %v1616_v9 }
 0x43a   : > { %2795 = vpow2.f32 %v1664_v5  ;;  %1816 = vmatmul.mubr.f32.gmra.mrb[74].mxu0 %v3648_v11 }
 0x43b   : > { %v3651_v33 = vpop.eup %2785  ;;  %2797 = vpow2.f32 %v1668_v17  ;;  %v2002_v17 = vld [vmem:[%s3980_s10 + $0x60] sm:$0xff] }
 0x43c   : > { %v3653_v36 = vpop.eup %2787  ;;  %v1582_v38 = vpop.xlane.xlu0 %1581  ;;  %2799 = vpow2.f32 %v1666_v22  ;;  %v2004_v22 = vld [vmem:[%s3980_s10 + $0x70] sm:$0xff] }
 0x43d   : > { %1820 = vmatprep.mubr.f32.mxu0 %v3653_v36  ;;  %v1618_v24 = vsub.f32 %v3490_v29, %v1582_v38  ;;  %v1619_v25 = vsub.f32 %v3493_v35, %v1582_v38  ;;  %v3658_v34 = vpop.eup %2789  ;;  %v2623_v38 = vpack.c.bf16 %v2004_v22, %v2002_v17 }
 0x43e   : > { %1821 = vmatmul.mubr.f32.gmra.mrb[76].mxu0 %v3651_v33  ;;  %v1585_v19 = vpop.xlane.xlu1 %1584  ;;  %v3664_v44 = vpop.eup %2791 }
 0x43f   : > { %v1670_v41 = vmul.f32 1.442695, %v1618_v24  ;;  %v1672_v20 = vmul.f32 1.442695, %v1619_v25  ;;  %v1620_v12 = vsub.f32 %v3496_v39, %v1585_v19  ;;  %v1621_v21 = vsub.f32 %v3499_v16, %v1585_v19  ;;  %1825 = vmatprep.mubr.f32.mxu0 %v3658_v34  ;;  %2624 = vmatpush1.bf16.msra.mxu0 %v2623_v38  ;;  %v2007_v24 = vld [vmem:[%s3980_s10 + $0x88] sm:$0xff]  ;;  %v2009_v25 = vld [vmem:[%s3980_s10 + $0x98] sm:$0xff] }
 0x440   : > { %2652 = vmatpush1.bf16.msra.mxu1 %v2623_v38  ;;  %v2625_v19 = vpack.c.bf16 %v2009_v25, %v2007_v24 }
 0x441   : > { %2801 = vpow2.f32 %v1670_v41  ;;  %v1676_v29 = vmul.f32 1.442695, %v1621_v21  ;;  %v1674_v35 = vmul.f32 1.442695, %v1620_v12  ;;  %v2006_v41 = vld [vmem:[%s3980_s10 + $0x80] sm:$0xff]  ;;  %v2011_v21 = vld [vmem:[%s3980_s10 + $0xa8] sm:$0xff] }
 0x442   : > { %2803 = vpow2.f32 %v1672_v20  ;;  %1826 = vmatmul.mubr.f32.gmra.mrb[78].mxu0 %v3664_v44  ;;  %v2008_v20 = vld [vmem:[%s3980_s10 + $0x90] sm:$0xff]  ;;  %2626 = vmatprep.subr.bf16.mxu0 %v2625_v19 }
 0x443   : > { %v3667_v46 = vpop.eup %2793  ;;  %2805 = vpow2.f32 %v1676_v29  ;;  %v2627_v12 = vpack.c.bf16 %v2008_v20, %v2006_v41  ;;  %2645 = vmatprep.subr.bf16.mxu1 %v2625_v19  ;;  %v2013_v29 = vld [vmem:[%s3980_s10 + $0xb8] sm:$0xff] }
 0x444   : > { %v3669_v49 = vpop.eup %2795  ;;  %v1588_v23 = vpop.xlane.xlu0 %1587  ;;  %2807 = vpow2.f32 %v1674_v35  ;;  %v2629_v35 = vpack.c.bf16 %v2013_v29, %v2011_v21 }
 0x445   : > { %1830 = vmatprep.mubr.f32.mxu0 %v3669_v49  ;;  %v1622_v39 = vsub.f32 %v3506_v47, %v1588_v23  ;;  %v1623_v16 = vsub.f32 %v3509_v51, %v1588_v23  ;;  %v3674_v30 = vpop.eup %2797  ;;  %2628 = vmatpush1.bf16.msra.mxu0 %v2627_v12  ;;  %v2010_v23 = vld [vmem:[%s3980_s10 + $0xa0] sm:$0xff] }
 0x446   : > { %1831 = vmatmul.mubr.f32.gmra.mrb[80].mxu0 %v3667_v46  ;;  %v1591_v26 = vpop.xlane.xlu1 %1590  ;;  %v3680_v31 = vpop.eup %2799  ;;  %2653 = vmatpush1.bf16.msra.mxu1 %v2627_v12 }
 0x447   : > { %v1678_v32 = vmul.f32 1.442695, %v1622_v39  ;;  %v1680_v54 = vmul.f32 1.442695, %v1623_v16  ;;  %v1624_v56 = vsub.f32 %v3512_v53, %v1591_v26  ;;  %v1625_v58 = vsub.f32 %v3515_v57, %v1591_v26  ;;  %1835 = vmatprep.mubr.f32.mxu0 %v3674_v30  ;;  %v2012_v39 = vld [vmem:[%s3980_s10 + $0xb0] sm:$0xff]  ;;  %2630 = vmatprep.subr.bf16.mxu0 %v2629_v35  ;;  %v2015_v26 = vld [vmem:[%s3980_s10 + $0xc8] sm:$0xff] }
 0x448   : > { %v2631_v16 = vpack.c.bf16 %v2012_v39, %v2010_v23  ;;  %2646 = vmatprep.subr.bf16.mxu1 %v2629_v35 }
 0x449   : > { %2809 = vpow2.f32 %v1678_v32  ;;  %v1684_v47 = vmul.f32 1.442695, %v1625_v58  ;;  %v1682_v51 = vmul.f32 1.442695, %v1624_v56  ;;  %v2017_v32 = vld [vmem:[%s3980_s10 + $0xd8] sm:$0xff]  ;;  %v2014_v56 = vld [vmem:[%s3980_s10 + $0xc0] sm:$0xff] }
 0x44a   : > { %2811 = vpow2.f32 %v1680_v54  ;;  %1836 = vmatmul.mubr.f32.gmra.mrb[82].mxu0 %v3680_v31  ;;  %2654 = vmatpush1.bf16.msra.mxu1 %v2631_v16  ;;  %v2633_v54 = vpack.c.bf16 %v2017_v32, %v2015_v26  ;;  %v2016_v58 = vld [vmem:[%s3980_s10 + $0xd0] sm:$0xff] }
 0x44b   : > { %v3683_v14 = vpop.eup %2801  ;;  %2813 = vpow2.f32 %v1684_v47  ;;  %2632 = vmatpush1.bf16.msra.mxu0 %v2631_v16  ;;  %v2635_v47 = vpack.c.bf16 %v2016_v58, %v2014_v56 }
 0x44c   : > { %v3685_v15 = vpop.eup %2803  ;;  %v1594_v52 = vpop.xlane.xlu0 %1593  ;;  %2815 = vpow2.f32 %v1682_v51  ;;  %2634 = vmatprep.subr.bf16.mxu0 %v2633_v54  ;;  %2647 = vmatprep.subr.bf16.mxu1 %v2633_v54  ;;  %v2019_v51 = vld [vmem:[%s3980_s10 + $0xe8] sm:$0xff] }
 0x44d   : > { %1840 = vmatprep.mubr.f32.mxu0 %v3685_v15  ;;  %v1626_v53 = vsub.f32 %v3522_v61, %v1594_v52  ;;  %v1627_v57 = vsub.f32 %v3525_v0, %v1594_v52  ;;  %v3690_v27 = vpop.eup %2805  ;;  %v2021_v52 = vld [vmem:[%s3980_s10 + $0xf8] sm:$0xff] }
 0x44e   : > { %1841 = vmatmul.mubr.f32.gmra.mrb[84].mxu0 %v3683_v14  ;;  %v1597_v55 = vpop.xlane.xlu1 %1596  ;;  %v3696_v8 = vpop.eup %2807  ;;  %2655 = vmatpush1.bf16.msra.mxu1 %v2635_v47 }
 0x44f   : > { %v1686_v3 = vmul.f32 1.442695, %v1626_v53  ;;  %v1688_v62 = vmul.f32 1.442695, %v1627_v57  ;;  %v1628_v2 = vsub.f32 %v3528_v4, %v1597_v55  ;;  %v1629_v6 = vsub.f32 %v3531_v7, %v1597_v55  ;;  %1845 = vmatprep.mubr.f32.mxu0 %v3690_v27  ;;  %2636 = vmatpush1.bf16.msra.mxu0 %v2635_v47  ;;  %v2018_v57 = vld [vmem:[%s3980_s10 + $0xe0] sm:$0xff]  ;;  %v2020_v55 = vld [vmem:[%s3980_s10 + $0xf0] sm:$0xff] }
 0x450   : > { %v2637_v53 = vpack.c.bf16 %v2021_v52, %v2019_v51 }
 0x451   : > { %2817 = vpow2.f32 %v1686_v3  ;;  %v1692_v61 = vmul.f32 1.442695, %v1629_v6  ;;  %v1690_v43 = vmul.f32 1.442695, %v1628_v2  ;;  %v2639_v3 = vpack.c.bf16 %v2020_v55, %v2018_v57 }
 0x452   : > { %2819 = vpow2.f32 %v1688_v62  ;;  %1846 = vmatmul.mubr.f32.gmra.mrb[86].mxu0 %v3696_v8  ;;  %2638 = vmatprep.subr.bf16.mxu0 %v2637_v53  ;;  %v2866_v62 = vmov 0.0  }
 0x453   : > { %v3699_v0 = vpop.eup %2809  ;;  %2821 = vpow2.f32 %v1692_v61  ;;  %2648 = vmatprep.subr.bf16.mxu1 %v2637_v53  ;;  %2640 = vmatpush1.bf16.msra.mxu0 %v2639_v3  ;;  %v3782_v61 = vld [vmem:[%s3981_s11] ss:$0 sm:$0xff] }
 0x454   : > { %v3701_v63 = vpop.eup %2811  ;;  %2823 = vpow2.f32 %v1690_v43  ;;  %2656 = vmatpush1.bf16.msra.mxu1 %v2639_v3  ;;  %2128 = vmatprep.mubr.f32.mxu1 %v2866_v62 }
 0x455   : > { %1850 = vmatprep.mubr.f32.mxu0 %v3701_v63  ;;  %v3704_v4 = vpop.eup %2813 }
 0x456   : > { %1851 = vmatmul.mubr.f32.gmra.mrb[88].mxu0 %v3699_v0  ;;  %v3708_v7 = vpop.eup %2815 }
 0x457   : > { %1855 = vmatprep.mubr.f32.mxu0 %v3704_v4 }
 0x45a   : > { %1856 = vmatmul.mubr.f32.gmra.mrb[90].mxu0 %v3708_v7 }
 0x45b   : > { %v3711_v1 = vpop.eup %2817 }
 0x45c   : > { %v3713_v5 = vpop.eup %2819 }
 0x45d   : > { %1860 = vmatprep.mubr.f32.mxu0 %v3713_v5  ;;  %v3716_v9 = vpop.eup %2821 }
 0x45e   : > { %1861 = vmatmul.mubr.f32.gmra.mrb[92].mxu0 %v3711_v1  ;;  %v3720_v10 = vpop.eup %2823 }
 0x45f   : > { %1865 = vmatprep.mubr.f32.mxu0 %v3716_v9 }
 0x462   : > { %1866 = vmatmul.mubr.f32.gmra.mrb[94].mxu0 %v3720_v10 }
 0x463   : > { %2086 = vmatprep.mubr.f32.mxu0 %v2866_v62 }
 0x4f9   : > { %v2529_v2 = vpop.f32.mrb[64].mxu0 }
 0x4fa   : > { %v2530_v6 = vpop.f32.mrb[65].mxu0 }
 0x4fb   : > { %v2531_v43 = vadd.f32 %v2530_v6, %v2529_v2 }
 0x4fd   : > { %v1878_v17 = vadd.f32 %v2531_v43, %v3782_v61  ;;  %1926 = vrot.lane.b32.xlu0 %v2531_v43, %s2867_s23  ;;  %v2532_v22 = vpop.f32.mrb[66].mxu0 }
 0x4fe   : > { %v2533_v38 = vpop.f32.mrb[67].mxu0 }
 0x4ff   : > { %v1894_v24 = vmax.f32 %v1878_v17, 1e-20  ;;  %v2534_v25 = vadd.f32 %v2533_v38, %v2532_v22 }
 0x501   : > { %2825 = vrcp.f32 %v1894_v24  ;;  %v1879_v19 = vadd.f32 %v2534_v25, %v3782_v61  ;;  %v2535_v41 = vpop.f32.mrb[68].mxu0  ;;  %1928 = vrot.lane.b32.xlu1 %v2534_v25, %s2867_s23 }
 0x502   : > { %v2536_v20 = vpop.f32.mrb[69].mxu0 }
 0x503   : > { %v1895_v12 = vmax.f32 %v1879_v19, 1e-20  ;;  %v2537_v21 = vadd.f32 %v2536_v20, %v2535_v41 }
 0x505   : > { %2827 = vrcp.f32 %v1895_v12  ;;  %v1880_v29 = vadd.f32 %v2537_v21, %v3782_v61  ;;  %v2538_v35 = vpop.f32.mrb[70].mxu0  ;;  %1930 = vrot.lane.b32.xlu1 %v2537_v21, %s2867_s23 }
 0x506   : > { %v2539_v23 = vpop.f32.mrb[71].mxu0 }
 0x507   : > { %v1896_v39 = vmax.f32 %v1880_v29, 1e-20  ;;  %v2540_v16 = vadd.f32 %v2539_v23, %v2538_v35 }
 0x509   : > { %2829 = vrcp.f32 %v1896_v39  ;;  %v1881_v26 = vadd.f32 %v2540_v16, %v3782_v61  ;;  %1932 = vrot.lane.b32.xlu1 %v2540_v16, %s2867_s23  ;;  %v2541_v32 = vpop.f32.mrb[72].mxu0 }
 0x50a   : > { %v2542_v54 = vpop.f32.mrb[73].mxu0 }
 0x50b   : > { %v3792_v56 = vpop.eup %2825  ;;  %v1897_v58 = vmax.f32 %v1881_v26, 1e-20  ;;  %v2543_v47 = vadd.f32 %v2542_v54, %v2541_v32 }
 0x50c   : > { %2087 = vmatmul.mubr.f32.vlgmr.msra.gmra.mrb[96].mxu0 %v3792_v56 }
 0x50d   : > { %2831 = vrcp.f32 %v1897_v58  ;;  %v1882_v51 = vadd.f32 %v2543_v47, %v3782_v61  ;;  %v2544_v52 = vpop.f32.mrb[74].mxu0  ;;  %1934 = vrot.lane.b32.xlu0 %v2543_v47, %s2867_s23  ;;  %2092 = vmatprep.mubr.f32.mxu0 %v2866_v62 }
 0x50e   : > { %v2545_v53 = vpop.f32.mrb[75].mxu0 }
 0x50f   : > { %v3798_v57 = vpop.eup %2827  ;;  %v1898_v55 = vmax.f32 %v1882_v51, 1e-20  ;;  %v2546_v3 = vadd.f32 %v2545_v53, %v2544_v52 }
 0x510   : > { %2093 = vmatmul.mubr.f32.gmra.mrb[98].mxu0 %v3798_v57 }
 0x511   : > { %2833 = vrcp.f32 %v1898_v55  ;;  %v1883_v2 = vadd.f32 %v2546_v3, %v3782_v61  ;;  %1936 = vrot.lane.b32.xlu1 %v2546_v3, %s2867_s23  ;;  %v2547_v6 = vpop.f32.mrb[76].mxu0  ;;  %2098 = vmatprep.mubr.f32.mxu0 %v2866_v62 }
 0x512   : > { %v2548_v43 = vpop.f32.mrb[77].mxu0 }
 0x513   : > { %v3804_v17 = vpop.eup %2829  ;;  %v1899_v22 = vmax.f32 %v1883_v2, 1e-20  ;;  %v2549_v38 = vadd.f32 %v2548_v43, %v2547_v6 }
 0x514   : > { %2099 = vmatmul.mubr.f32.gmra.mrb[100].mxu0 %v3804_v17 }
 0x515   : > { %2835 = vrcp.f32 %v1899_v22  ;;  %v1884_v24 = vadd.f32 %v2549_v38, %v3782_v61  ;;  %v2550_v25 = vpop.f32.mrb[78].mxu0  ;;  %1938 = vrot.lane.b32.xlu0 %v2549_v38, %s2867_s23  ;;  %2104 = vmatprep.mubr.f32.mxu0 %v2866_v62 }
 0x516   : > { %v2551_v19 = vpop.f32.mrb[79].mxu0 }
 0x517   : > { %v3810_v41 = vpop.eup %2831  ;;  %v1900_v20 = vmax.f32 %v1884_v24, 1e-20  ;;  %v2552_v12 = vadd.f32 %v2551_v19, %v2550_v25 }
 0x518   : > { %2105 = vmatmul.mubr.f32.gmra.mrb[102].mxu0 %v3810_v41 }
 0x519   : > { %2837 = vrcp.f32 %v1900_v20  ;;  %v1885_v21 = vadd.f32 %v2552_v12, %v3782_v61  ;;  %1940 = vrot.lane.b32.xlu1 %v2552_v12, %s2867_s23  ;;  %v2553_v29 = vpop.f32.mrb[80].mxu0  ;;  %2110 = vmatprep.mubr.f32.mxu0 %v2866_v62 }
 0x51a   : > { %v2554_v35 = vpop.f32.mrb[81].mxu0 }
 0x51b   : > { %v3816_v23 = vpop.eup %2833  ;;  %v1901_v39 = vmax.f32 %v1885_v21, 1e-20  ;;  %v2555_v16 = vadd.f32 %v2554_v35, %v2553_v29 }
 0x51c   : > { %2111 = vmatmul.mubr.f32.gmra.mrb[104].mxu0 %v3816_v23 }
 0x51d   : > { %2839 = vrcp.f32 %v1901_v39  ;;  %v1886_v26 = vadd.f32 %v2555_v16, %v3782_v61  ;;  %v2556_v32 = vpop.f32.mrb[82].mxu0  ;;  %1942 = vrot.lane.b32.xlu0 %v2555_v16, %s2867_s23  ;;  %2116 = vmatprep.mubr.f32.mxu0 %v2866_v62 }
 0x51e   : > { %v2557_v54 = vpop.f32.mrb[83].mxu0 }
 0x51f   : > { %v3822_v58 = vpop.eup %2835  ;;  %v1902_v47 = vmax.f32 %v1886_v26, 1e-20  ;;  %v2558_v51 = vadd.f32 %v2557_v54, %v2556_v32 }
 0x520   : > { %2117 = vmatmul.mubr.f32.gmra.mrb[106].mxu0 %v3822_v58 }
 0x521   : > { %2841 = vrcp.f32 %v1902_v47  ;;  %v1887_v52 = vadd.f32 %v2558_v51, %v3782_v61  ;;  %1944 = vrot.lane.b32.xlu1 %v2558_v51, %s2867_s23  ;;  %v2559_v53 = vpop.f32.mrb[84].mxu0  ;;  %2122 = vmatprep.mubr.f32.mxu0 %v2866_v62 }
 0x522   : > { %v2560_v55 = vpop.f32.mrb[85].mxu0 }
 0x523   : > { %v3828_v3 = vpop.eup %2837  ;;  %v1903_v2 = vmax.f32 %v1887_v52, 1e-20  ;;  %v2561_v6 = vadd.f32 %v2560_v55, %v2559_v53 }
 0x524   : > { %2123 = vmatmul.mubr.f32.gmra.mrb[108].mxu0 %v3828_v3 }
 0x525   : > { %2843 = vrcp.f32 %v1903_v2  ;;  %v1888_v43 = vadd.f32 %v2561_v6, %v3782_v61  ;;  %v2562_v22 = vpop.f32.mrb[86].mxu0  ;;  %1946 = vrot.lane.b32.xlu0 %v2561_v6, %s2867_s23 }
 0x526   : > { %v2563_v38 = vpop.f32.mrb[87].mxu0 }
 0x527   : > { %v3833_v24 = vpop.eup %2839  ;;  %v1904_v25 = vmax.f32 %v1888_v43, 1e-20  ;;  %v2564_v19 = vadd.f32 %v2563_v38, %v2562_v22 }
 0x528   : > { %2129 = vmatmul.mubr.f32.vlgmr.msra.gmra.mrb[64].mxu1 %v3833_v24 }
 0x529   : > { %2845 = vrcp.f32 %v1904_v25  ;;  %v1889_v20 = vadd.f32 %v2564_v19, %v3782_v61  ;;  %1948 = vrot.lane.b32.xlu1 %v2564_v19, %s2867_s23  ;;  %v2565_v12 = vpop.f32.mrb[88].mxu0  ;;  %2134 = vmatprep.mubr.f32.mxu1 %v2866_v62 }
 0x52a   : > { %v2566_v21 = vpop.f32.mrb[89].mxu0 }
 0x52b   : > { %v3839_v29 = vpop.eup %2841  ;;  %v1905_v35 = vmax.f32 %v1889_v20, 1e-20  ;;  %v2567_v39 = vadd.f32 %v2566_v21, %v2565_v12 }
 0x52c   : > { %2135 = vmatmul.mubr.f32.gmra.mrb[66].mxu1 %v3839_v29 }
 0x52d   : > { %2847 = vrcp.f32 %v1905_v35  ;;  %v1890_v16 = vadd.f32 %v2567_v39, %v3782_v61  ;;  %v2568_v26 = vpop.f32.mrb[90].mxu0  ;;  %1950 = vrot.lane.b32.xlu0 %v2567_v39, %s2867_s23  ;;  %2140 = vmatprep.mubr.f32.mxu1 %v2866_v62 }
 0x52e   : > { %v2569_v32 = vpop.f32.mrb[91].mxu0 }
 0x52f   : > { %v3845_v54 = vpop.eup %2843  ;;  %v1906_v47 = vmax.f32 %v1890_v16, 1e-20  ;;  %v2570_v51 = vadd.f32 %v2569_v32, %v2568_v26 }
 0x530   : > { %2141 = vmatmul.mubr.f32.gmra.mrb[68].mxu1 %v3845_v54 }
 0x531   : > { %2849 = vrcp.f32 %v1906_v47  ;;  %v1891_v52 = vadd.f32 %v2570_v51, %v3782_v61  ;;  %1952 = vrot.lane.b32.xlu1 %v2570_v51, %s2867_s23  ;;  %v2571_v53 = vpop.f32.mrb[92].mxu0  ;;  %2146 = vmatprep.mubr.f32.mxu1 %v2866_v62 }
 0x532   : > { %v2572_v55 = vpop.f32.mrb[93].mxu0 }
 0x533   : > { %v3851_v2 = vpop.eup %2845  ;;  %v1907_v6 = vmax.f32 %v1891_v52, 1e-20  ;;  %v2573_v43 = vadd.f32 %v2572_v55, %v2571_v53 }
 0x534   : > { %2147 = vmatmul.mubr.f32.gmra.mrb[70].mxu1 %v3851_v2 }
 0x535   : > { %2851 = vrcp.f32 %v1907_v6  ;;  %v1892_v22 = vadd.f32 %v2573_v43, %v3782_v61  ;;  %v2574_v38 = vpop.f32.mrb[94].mxu0  ;;  %1954 = vrot.lane.b32.xlu0 %v2573_v43, %s2867_s23  ;;  %2152 = vmatprep.mubr.f32.mxu1 %v2866_v62 }
 0x536   : > { %v2575_v25 = vpop.f32.mrb[95].mxu0 }
 0x537   : > { %v2848_v19 = vpop.eup %2847  ;;  %v1908_v20 = vmax.f32 %v1892_v22, 1e-20  ;;  %v2576_v12 = vadd.f32 %v2575_v25, %v2574_v38 }
 0x538   : > { %2153 = vmatmul.mubr.f32.gmra.mrb[72].mxu1 %v2848_v19 }
 0x539   : > { %2853 = vrcp.f32 %v1908_v20  ;;  %v1893_v21 = vadd.f32 %v2576_v12, %v3782_v61  ;;  %1956 = vrot.lane.b32.xlu1 %v2576_v12, %s2867_s23  ;;  %2158 = vmatprep.mubr.f32.mxu1 %v2866_v62 }
 0x53b   : > { %v2850_v35 = vpop.eup %2849  ;;  %v1909_v39 = vmax.f32 %v1893_v21, 1e-20 }
 0x53c   : > { %2159 = vmatmul.mubr.f32.gmra.mrb[74].mxu1 %v2850_v35 }
 0x53d   : > { %2855 = vrcp.f32 %v1909_v39  ;;  %2164 = vmatprep.mubr.f32.mxu1 %v2866_v62 }
 0x53f   : > { %v2852_v16 = vpop.eup %2851 }
 0x540   : > { %2165 = vmatmul.mubr.f32.gmra.mrb[76].mxu1 %v2852_v16 }
 0x541   : > { %2170 = vmatprep.mubr.f32.mxu1 %v2866_v62 }
 0x543   : > { %v2854_v26 = vpop.eup %2853 }
 0x544   : > { %2171 = vmatmul.mubr.f32.gmra.mrb[78].mxu1 %v2854_v26 }
 0x545   : > { %2176 = vmatprep.mubr.f32.mxu1 %v2866_v62 }
 0x547   : > { %v2856_v61 = vpop.eup %2855 }
 0x548   : > { %2177 = vmatmul.mubr.f32.gmra.mrb[80].mxu1 %v2856_v61 }
 0x56f   : > { %v1927_v32 = vpop.permute.xlu0 %1926 }
 0x570   : > { %v1958_v47 = vmul.f32 %v3792_v56, %v1927_v32 }
 0x572   : > { %1974 = vst [vmem:[%s3868_s28] sm:$0xff] %v1958_v47 }
 0x573   : > { %v1929_v51 = vpop.permute.xlu1 %1928 }
 0x574   : > { %v1959_v62 = vmul.f32 %v3798_v57, %v1929_v51 }
 0x576   : > { %1975 = vst [vmem:[%s3868_s28 + $0x8] sm:$0xff] %v1959_v62 }
 0x577   : > { %v1931_v52 = vpop.permute.xlu1 %1930 }
 0x578   : > { %v1960_v53 = vmul.f32 %v3804_v17, %v1931_v52 }
 0x57a   : > { %1976 = vst [vmem:[%s3868_s28 + $0x10] sm:$0xff] %v1960_v53 }
 0x57b   : > { %v1933_v55 = vpop.permute.xlu1 %1932 }
 0x57c   : > { %v1961_v6 = vmul.f32 %v3810_v41, %v1933_v55 }
 0x57e   : > { %1977 = vst [vmem:[%s3868_s28 + $0x18] sm:$0xff] %v1961_v6 }
 0x57f   : > { %v1935_v43 = vpop.permute.xlu0 %1934 }
 0x580   : > { %v1962_v56 = vmul.f32 %v3816_v23, %v1935_v43 }
 0x582   : > { %1978 = vst [vmem:[%s3868_s28 + $0x20] sm:$0xff] %v1962_v56 }
 0x583   : > { %v1937_v22 = vpop.permute.xlu1 %1936 }
 0x584   : > { %v1963_v57 = vmul.f32 %v3822_v58, %v1937_v22 }
 0x586   : > { %1979 = vst [vmem:[%s3868_s28 + $0x28] sm:$0xff] %v1963_v57 }
 0x587   : > { %v1939_v38 = vpop.permute.xlu0 %1938 }
 0x588   : > { %v1964_v17 = vmul.f32 %v3828_v3, %v1939_v38 }
 0x58a   : > { %1980 = vst [vmem:[%s3868_s28 + $0x30] sm:$0xff] %v1964_v17 }
 0x58b   : > { %v1941_v25 = vpop.permute.xlu1 %1940 }
 0x58c   : > { %v1965_v41 = vmul.f32 %v3833_v24, %v1941_v25 }
 0x58e   : > { %1981 = vst [vmem:[%s3868_s28 + $0x38] sm:$0xff] %v1965_v41 }
 0x58f   : > { %v1943_v20 = vpop.permute.xlu0 %1942 }
 0x590   : > { %v1966_v23 = vmul.f32 %v3839_v29, %v1943_v20 }
 0x592   : > { %1982 = vst [vmem:[%s3868_s28 + $0x40] sm:$0xff] %v1966_v23 }
 0x593   : > { %v1945_v12 = vpop.permute.xlu1 %1944 }
 0x594   : > { %v1967_v58 = vmul.f32 %v3845_v54, %v1945_v12 }
 0x596   : > { %1983 = vst [vmem:[%s3868_s28 + $0x48] sm:$0xff] %v1967_v58 }
 0x597   : > { %v1947_v21 = vpop.permute.xlu0 %1946 }
 0x598   : > { %v1968_v3 = vmul.f32 %v3851_v2, %v1947_v21 }
 0x59a   : > { %1984 = vst [vmem:[%s3868_s28 + $0x50] sm:$0xff] %v1968_v3 }
 0x59b   : > { %v1949_v39 = vpop.permute.xlu1 %1948 }
 0x59c   : > { %v1969_v24 = vmul.f32 %v2848_v19, %v1949_v39 }
 0x59e   : > { %1985 = vst [vmem:[%s3868_s28 + $0x58] sm:$0xff] %v1969_v24 }
 0x59f   : > { %v1951_v32 = vpop.permute.xlu0 %1950 }
 0x5a0   : > { %v1970_v47 = vmul.f32 %v2850_v35, %v1951_v32 }
 0x5a2   : > { %1986 = vst [vmem:[%s3868_s28 + $0x60] sm:$0xff] %v1970_v47 }
 0x5a3   : > { %v1953_v29 = vpop.permute.xlu1 %1952 }
 0x5a4   : > { %v1971_v51 = vmul.f32 %v2852_v16, %v1953_v29 }
 0x5a6   : > { %1987 = vst [vmem:[%s3868_s28 + $0x68] sm:$0xff] %v1971_v51 }
 0x5a7   : > { %v1955_v62 = vpop.permute.xlu0 %1954 }
 0x5a8   : > { %v1972_v52 = vmul.f32 %v2854_v26, %v1955_v62 }
 0x5aa   : > { %1988 = vst [vmem:[%s3868_s28 + $0x70] sm:$0xff] %v1972_v52 }
 0x5ab   : > { %v1957_v54 = vpop.permute.xlu1 %1956 }
 0x5ac   : > { %v1973_v53 = vmul.f32 %v2856_v61, %v1957_v54 }
 0x5ae   : > { %1989 = vst [vmem:[%s3868_s28 + $0x78] sm:$0xff] %v1973_v53 }
 0x5df   : > { %v2088_v2 = vpop.f32.mrb[96].mxu0 }
 0x5e0   : > { %v2183_v19 = vmul.f32 %v3599_v42, %v2088_v2  ;;  %v2090_v35 = vpop.f32.mrb[97].mxu0 }
 0x5e1   : > { %v2184_v16 = vmul.f32 %v3601_v13, %v2090_v35 }
 0x5e2   : > { %2215 = vst [vmem:[%s3901_s30] sm:$0xff] %v2183_v19 }
 0x5e3   : > { %2216 = vst [vmem:[%s3901_s30 + $0x8] sm:$0xff] %v2184_v16  ;;  %v2094_v26 = vpop.f32.mrb[98].mxu0 }
 0x5e4   : > { %v2185_v61 = vmul.f32 %v3607_v50, %v2094_v26  ;;  %v2096_v55 = vpop.f32.mrb[99].mxu0 }
 0x5e5   : > { %v2186_v6 = vmul.f32 %v3612_v37, %v2096_v55 }
 0x5e6   : > { %2217 = vst [vmem:[%s3901_s30 + $0x10] sm:$0xff] %v2185_v61 }
 0x5e7   : > { %2218 = vst [vmem:[%s3901_s30 + $0x18] sm:$0xff] %v2186_v6  ;;  %v2100_v43 = vpop.f32.mrb[100].mxu0 }
 0x5e8   : > { %v2187_v42 = vmul.f32 %v3616_v40, %v2100_v43  ;;  %v2102_v56 = vpop.f32.mrb[101].mxu0 }
 0x5e9   : > { %v2188_v13 = vmul.f32 %v3618_v18, %v2102_v56 }
 0x5ea   : > { %2219 = vst [vmem:[%s3901_s30 + $0x20] sm:$0xff] %v2187_v42 }
 0x5eb   : > { %2220 = vst [vmem:[%s3901_s30 + $0x28] sm:$0xff] %v2188_v13  ;;  %v2106_v22 = vpop.f32.mrb[102].mxu0 }
 0x5ec   : > { %v2189_v50 = vmul.f32 %v3625_v48, %v2106_v22  ;;  %v2108_v57 = vpop.f32.mrb[103].mxu0 }
 0x5ed   : > { %v2190_v37 = vmul.f32 %v3630_v28, %v2108_v57 }
 0x5ee   : > { %2221 = vst [vmem:[%s3901_s30 + $0x30] sm:$0xff] %v2189_v50 }
 0x5ef   : > { %2222 = vst [vmem:[%s3901_s30 + $0x38] sm:$0xff] %v2190_v37  ;;  %v2112_v38 = vpop.f32.mrb[104].mxu0 }
 0x5f0   : > { %v2191_v40 = vmul.f32 %v3635_v59, %v2112_v38  ;;  %v2114_v17 = vpop.f32.mrb[105].mxu0 }
 0x5f1   : > { %v2192_v18 = vmul.f32 %v3637_v60, %v2114_v17 }
 0x5f2   : > { %2223 = vst [vmem:[%s3901_s30 + $0x40] sm:$0xff] %v2191_v40 }
 0x5f3   : > { %2224 = vst [vmem:[%s3901_s30 + $0x48] sm:$0xff] %v2192_v18  ;;  %v2118_v25 = vpop.f32.mrb[106].mxu0 }
 0x5f4   : > { %v2193_v48 = vmul.f32 %v3648_v11, %v2118_v25  ;;  %v2120_v41 = vpop.f32.mrb[107].mxu0 }
 0x5f5   : > { %v2194_v28 = vmul.f32 %v3642_v45, %v2120_v41 }
 0x5f6   : > { %2225 = vst [vmem:[%s3901_s30 + $0x50] sm:$0xff] %v2193_v48 }
 0x5f7   : > { %2226 = vst [vmem:[%s3901_s30 + $0x58] sm:$0xff] %v2194_v28  ;;  %v2124_v20 = vpop.f32.mrb[108].mxu0 }
 0x5f8   : > { %v2195_v59 = vmul.f32 %v3651_v33, %v2124_v20  ;;  %v2126_v23 = vpop.f32.mrb[109].mxu0 }
 0x5f9   : > { %v2196_v60 = vmul.f32 %v3653_v36, %v2126_v23 }
 0x5fa   : > { %2227 = vst [vmem:[%s3901_s30 + $0x60] sm:$0xff] %v2195_v59 }
 0x5fb   : > { %2228 = vst [vmem:[%s3901_s30 + $0x68] sm:$0xff] %v2196_v60  ;;  %v2130_v12 = vpop.f32.mrb[64].mxu1 }
 0x5fc   : > { %v2197_v11 = vmul.f32 %v3664_v44, %v2130_v12  ;;  %v2132_v58 = vpop.f32.mrb[65].mxu1 }
 0x5fd   : > { %v2198_v45 = vmul.f32 %v3658_v34, %v2132_v58 }
 0x5fe   : > { %2229 = vst [vmem:[%s3901_s30 + $0x70] sm:$0xff] %v2197_v11 }
 0x5ff   : > { %2230 = vst [vmem:[%s3901_s30 + $0x78] sm:$0xff] %v2198_v45  ;;  %v2136_v21 = vpop.f32.mrb[66].mxu1 }
 0x600   : > { %v2199_v33 = vmul.f32 %v3667_v46, %v2136_v21  ;;  %v2138_v3 = vpop.f32.mrb[67].mxu1 }
 0x601   : > { %v2200_v36 = vmul.f32 %v3669_v49, %v2138_v3 }
 0x602   : > { %2231 = vst [vmem:[%s3901_s30 + $0x80] sm:$0xff] %v2199_v33 }
 0x603   : > { %2232 = vst [vmem:[%s3901_s30 + $0x88] sm:$0xff] %v2200_v36  ;;  %v2142_v39 = vpop.f32.mrb[68].mxu1 }
 0x604   : > { %v2201_v44 = vmul.f32 %v3680_v31, %v2142_v39  ;;  %v2144_v24 = vpop.f32.mrb[69].mxu1 }
 0x605   : > { %v2202_v34 = vmul.f32 %v3674_v30, %v2144_v24 }
 0x606   : > { %2233 = vst [vmem:[%s3901_s30 + $0x90] sm:$0xff] %v2201_v44 }
 0x607   : > { %2234 = vst [vmem:[%s3901_s30 + $0x98] sm:$0xff] %v2202_v34  ;;  %v2148_v32 = vpop.f32.mrb[70].mxu1 }
 0x608   : > { %v2203_v46 = vmul.f32 %v3683_v14, %v2148_v32  ;;  %v2150_v47 = vpop.f32.mrb[71].mxu1 }
 0x609   : > { %v2204_v49 = vmul.f32 %v3685_v15, %v2150_v47 }
 0x60a   : > { %2235 = vst [vmem:[%s3901_s30 + $0xa0] sm:$0xff] %v2203_v46 }
 0x60b   : > { %2236 = vst [vmem:[%s3901_s30 + $0xa8] sm:$0xff] %v2204_v49  ;;  %v2154_v29 = vpop.f32.mrb[72].mxu1 }
 0x60c   : > { %v2205_v31 = vmul.f32 %v3696_v8, %v2154_v29  ;;  %v2156_v51 = vpop.f32.mrb[73].mxu1 }
 0x60d   : > { %v2206_v30 = vmul.f32 %v3690_v27, %v2156_v51 }
 0x60e   : > { %2237 = vst [vmem:[%s3901_s30 + $0xb0] sm:$0xff] %v2205_v31 }
 0x60f   : > { %2238 = vst [vmem:[%s3901_s30 + $0xb8] sm:$0xff] %v2206_v30  ;;  %v2160_v62 = vpop.f32.mrb[74].mxu1 }
 0x610   : > { %v2207_v14 = vmul.f32 %v3699_v0, %v2160_v62  ;;  %v2162_v52 = vpop.f32.mrb[75].mxu1 }
 0x611   : > { %v2208_v15 = vmul.f32 %v3701_v63, %v2162_v52 }
 0x612   : > { %2239 = vst [vmem:[%s3901_s30 + $0xc0] sm:$0xff] %v2207_v14 }
 0x613   : > { %2240 = vst [vmem:[%s3901_s30 + $0xc8] sm:$0xff] %v2208_v15  ;;  %v2166_v54 = vpop.f32.mrb[76].mxu1 }
 0x614   : > { %v2209_v8 = vmul.f32 %v3708_v7, %v2166_v54  ;;  %v2168_v53 = vpop.f32.mrb[77].mxu1 }
 0x615   : > { %v2210_v27 = vmul.f32 %v3704_v4, %v2168_v53 }
 0x616   : > { %2241 = vst [vmem:[%s3901_s30 + $0xd0] sm:$0xff] %v2209_v8 }
 0x617   : > { %2242 = vst [vmem:[%s3901_s30 + $0xd8] sm:$0xff] %v2210_v27  ;;  %v2172_v2 = vpop.f32.mrb[78].mxu1 }
 0x618   : > { %v2211_v19 = vmul.f32 %v3711_v1, %v2172_v2  ;;  %v2174_v0 = vpop.f32.mrb[79].mxu1 }
 0x619   : > { %v2212_v35 = vmul.f32 %v3713_v5, %v2174_v0 }
 0x61a   : > { %2243 = vst [vmem:[%s3901_s30 + $0xe0] sm:$0xff] %v2211_v19 }
 0x61b   : > { %2244 = vst [vmem:[%s3901_s30 + $0xe8] sm:$0xff] %v2212_v35  ;;  %v2178_v63 = vpop.f32.mrb[80].mxu1 }
 0x61c   : > { %v2213_v16 = vmul.f32 %v3720_v10, %v2178_v63  ;;  %v2180_v26 = vpop.f32.mrb[81].mxu1 }
 0x61d   : > { %v2214_v7 = vmul.f32 %v3716_v9, %v2180_v26 }
 0x61e   : > { %2245 = vst [vmem:[%s3901_s30 + $0xf0] sm:$0xff] %v2213_v16 }
 0x61f   : > { %2246 = vst [vmem:[%s3901_s30 + $0xf8] sm:$0xff] %v2214_v7 }
 0x620 PF: > { %s24_s25 = sadd.s32 1, %s2863_s25  }
 0x621   : > { %p21_p4 = scmp.ge.s32.totalorder %s24_s25, 4  }
 0x623   :  { %23 = sbr.rel (!%p21_p4) target bundleno = 1 (0x1), region = 110 }

</bundles_post_ra>
